<compile_context>
chip_gen: v7x
topology: tpu7x:2x2x1
jax: 0.10.0
libtpu: 0.0.40
codegen_flags: <defaults>
</compile_context>

<pallas_src>
import jax
import jax.numpy as jnp
from jax.experimental import pallas as pl
from jax.experimental.pallas import tpu as pltpu

EPS = 1e-5  # PyTorch nn.LayerNorm default


def frame_updater_kernel(x_ref, q_ref, t_ref, g_ref, b_ref, w_ref, wb_ref,
                         qo_ref, to_ref):
  TN, D = x_ref.shape

  # ---- LayerNorm over channels: one-pass statistics, f32 ----
  x = x_ref[...].astype(jnp.float32)                                # [TN, D]
  inv_d = 1.0 / D
  mu = jnp.sum(x, axis=-1, keepdims=True) * inv_d                   # [TN, 1]
  var = jnp.sum(x * x, axis=-1, keepdims=True) * inv_d - mu * mu
  var = jnp.maximum(var, 0.0)
  inv = jax.lax.rsqrt(var + EPS)
  xn = (x - mu) * inv * g_ref[...].astype(jnp.float32) + b_ref[...].astype(jnp.float32)

  # ---- affine-update projection: single lane-dense MXU matmul, f32 accumulate ----
  if x_ref.dtype == jnp.bfloat16 and w_ref.dtype == jnp.bfloat16:
    # v6e/v7x bf16 production path: feed the MXU bf16, accumulate f32.
    u = jnp.dot(xn.astype(jnp.bfloat16), w_ref[...],
                preferred_element_type=jnp.float32)
  else:
    u = jnp.dot(xn, w_ref[...].astype(jnp.float32),
                preferred_element_type=jnp.float32)
  u = u + wb_ref[...].astype(jnp.float32)                           # [TN, 128]

  # ---- go channel-major: one small XLU transpose, then everything on [1, TN] rows
  ut = jnp.transpose(u)                                             # [128, TN]
  uqx, uqy, uqz = ut[0:1, :], ut[1:2, :], ut[2:3, :]
  utx, uty, utz = ut[3:4, :], ut[4:5, :], ut[5:6, :]

  # quaternion update = l2_norm(pad(qu, (1,0), value=1.0))
  inv_n = jax.lax.rsqrt(1.0 + uqx * uqx + uqy * uqy + uqz * uqz)
  uw = inv_n
  ux = uqx * inv_n
  uy = uqy * inv_n
  uz = uqz * inv_n

  # ---- frames (channel-major [4, TN] / [3, TN]) ----
  q = q_ref[...].astype(jnp.float32)                                # (w, x, y, z)
  aw, ax, ay, az = q[0:1, :], q[1:2, :], q[2:3, :], q[3:4, :]

  # rotation matrix of the ORIGINAL quaternions (pytorch3d convention)
  two_s = 2.0 / (aw * aw + ax * ax + ay * ay + az * az)
  r00 = 1.0 - two_s * (ay * ay + az * az)
  r01 = two_s * (ax * ay - az * aw)
  r02 = two_s * (ax * az + ay * aw)
  r10 = two_s * (ax * ay + az * aw)
  r11 = 1.0 - two_s * (ax * ax + az * az)
  r12 = two_s * (ay * az - ax * aw)
  r20 = two_s * (ax * az - ay * aw)
  r21 = two_s * (ay * az + ax * aw)
  r22 = 1.0 - two_s * (ax * ax + ay * ay)

  # quaternion_multiply(quaternions, quaternion_update) — raw Hamilton product.
  # Lane-dense row stores, no concatenates.
  qo_ref[0:1, :] = (aw * uw - ax * ux - ay * uy - az * uz).astype(qo_ref.dtype)
  qo_ref[1:2, :] = (aw * ux + ax * uw + ay * uz - az * uy).astype(qo_ref.dtype)
  qo_ref[2:3, :] = (aw * uy - ax * uz + ay * uw + az * ux).astype(qo_ref.dtype)
  qo_ref[3:4, :] = (aw * uz + ax * uy - ay * ux + az * uw).astype(qo_ref.dtype)

  # translation: t_out[r] = sum_c tu[c] * R[r, c] + t[r]
  t = t_ref[...].astype(jnp.float32)                                # [3, TN]
  to_ref[0:1, :] = (r00 * utx + r01 * uty + r02 * utz + t[0:1, :]).astype(to_ref.dtype)
  to_ref[1:2, :] = (r10 * utx + r11 * uty + r12 * utz + t[1:2, :]).astype(to_ref.dtype)
  to_ref[2:3, :] = (r20 * utx + r21 * uty + r22 * utz + t[2:3, :]).astype(to_ref.dtype)


def _choose_tile_n(B, N, D):
  """Largest multiple-of-128 divisor of N whose double-buffered f32 x block stays
  under ~8 MiB; when B == 1 keep >= 2 grid steps for dual-TensorCore (v7x) chips."""
  cap_rows = max(128, (8 * 1024 * 1024) // (2 * 4 * max(D, 1)))
  cands = [t for t in range(128, N + 1, 128) if N % t == 0 and t <= cap_rows]
  if not cands:
    raise ValueError(
        f"N={N} needs a multiple-of-128 divisor <= {cap_rows} for this kernel's tiling")
  tn = cands[-1]
  if B == 1 and tn == N and len(cands) > 1:
    tn = cands[-2]
  return tn


def frame_updater(x, quaternions, translations, params, *, tile_n=None):
  B, N, D = x.shape
  TN = _choose_tile_n(B, N, D) if tile_n is None else tile_n
  assert N % TN == 0 and TN % 128 == 0, (N, TN)

  # Lane-pad the 6-wide projection to 128 output channels: free on the MXU and makes
  # the in-kernel [TN,128] -> [128,TN] transpose a native 128x128-block XLU op.
  CP = 128
  w = params['w']                                     # [D, 6]
  b = params['b']                                     # [1, 6]
  w_pad = jnp.zeros((D, CP), w.dtype).at[:, :6].set(w)
  b_pad = jnp.zeros((1, CP), b.dtype).at[:, :6].set(b)

  # Channel-major frame inputs: N on lanes inside the kernel.
  q_t = jnp.transpose(quaternions, (0, 2, 1))         # [B, 4, N]
  t_t = jnp.transpose(translations, (0, 2, 1))        # [B, 3, N]

  def rep(shape):
    return pl.BlockSpec(shape, lambda b_, n_, _k=len(shape): (0,) * _k)

  in_specs = [
      pl.BlockSpec((None, TN, D), lambda b_, n_: (b_, n_, 0)),    # x (batch squeezed)
      pl.BlockSpec((None, 4, TN), lambda b_, n_: (b_, 0, n_)),    # quaternions (channel-major)
      pl.BlockSpec((None, 3, TN), lambda b_, n_: (b_, 0, n_)),    # translations (channel-major)
      rep((1, D)), rep((1, D)),                                   # LayerNorm gamma / beta
      rep((D, CP)), rep((1, CP)),                                 # to_affine_update W / b (padded)
  ]
  out_specs = (
      pl.BlockSpec((None, 4, TN), lambda b_, n_: (b_, 0, n_)),
      pl.BlockSpec((None, 3, TN), lambda b_, n_: (b_, 0, n_)),
  )
  out_shape = (
      jax.ShapeDtypeStruct((B, 4, N), quaternions.dtype),
      jax.ShapeDtypeStruct((B, 3, N), translations.dtype),
  )
  qo_t, to_t = pl.pallas_call(
      frame_updater_kernel,
      out_shape=out_shape,
      grid=(B, N // TN),
      in_specs=in_specs,
      out_specs=out_specs,
      compiler_params=pltpu.CompilerParams(
          dimension_semantics=("parallel", "parallel")),
  )(x, q_t, t_t, params['ln_g'], params['ln_b'], w_pad, b_pad)

  # Back to the module's [B, N, 4] / [B, N, 3] layout (cheap wrapper-side plumbing).
  return jnp.transpose(qo_t, (0, 2, 1)), jnp.transpose(to_t, (0, 2, 1))


def reference(x, quaternions, translations, p):
  """Pure-JAX reference replicating the PyTorch forward (eval-mode dropout)."""
  mu = jnp.mean(x, -1, keepdims=True)
  var = jnp.mean(jnp.square(x - mu), -1, keepdims=True)
  xn = (x - mu) * jax.lax.rsqrt(var + EPS) * p['ln_g'][0] + p['ln_b'][0]
  u = xn @ p['w'] + p['b'][0]
  qu, tu = u[..., :3], u[..., 3:]
  qu = jnp.concatenate([jnp.ones_like(qu[..., :1]), qu], axis=-1)
  qu = qu * jax.lax.rsqrt(jnp.sum(qu * qu, -1, keepdims=True))

  aw, ax, ay, az = (quaternions[..., i] for i in range(4))
  bw, bx, by, bz = (qu[..., i] for i in range(4))
  q_out = jnp.stack([
      aw * bw - ax * bx - ay * by - az * bz,
      aw * bx + ax * bw + ay * bz - az * by,
      aw * by - ax * bz + ay * bw + az * bx,
      aw * bz + ax * by - ay * bx + az * bw,
  ], axis=-1)

  two_s = 2.0 / jnp.sum(quaternions * quaternions, -1)
  rot = jnp.stack([
      1 - two_s * (ay * ay + az * az), two_s * (ax * ay - az * aw), two_s * (ax * az + ay * aw),
      two_s * (ax * ay + az * aw), 1 - two_s * (ax * ax + az * az), two_s * (ay * az - ax * aw),
      two_s * (ax * az - ay * aw), two_s * (ay * az + ax * aw), 1 - two_s * (ax * ax + ay * ay),
  ], axis=-1).reshape(quaternions.shape[:-1] + (3, 3))
  t_out = jnp.einsum('...ic,...irc->...ir', tu, rot) + translations
  return q_out, t_out


if __name__ == "__main__":
  jax.config.update('jax_default_matmul_precision', 'highest')

  B, N, D = 2, 256, 128
  key = jax.random.PRNGKey(0)
  k = jax.random.split(key, 7)

  x = jax.random.normal(k[0], (B, N, D), jnp.float32)
  quats = jax.random.normal(k[1], (B, N, 4), jnp.float32)
  quats = quats / jnp.linalg.norm(quats, axis=-1, keepdims=True)
  trans = jax.random.normal(k[2], (B, N, 3), jnp.float32)

  bound = 1.0 / jnp.sqrt(float(D))
  params = dict(
      ln_g=1.0 + 0.1 * jax.random.normal(k[3], (1, D), jnp.float32),
      ln_b=0.1 * jax.random.normal(k[4], (1, D), jnp.float32),
      w=jax.random.uniform(k[5], (D, 6), jnp.float32, minval=-bound, maxval=bound),
      b=jax.random.uniform(k[6], (1, 6), jnp.float32, minval=-bound, maxval=bound),
  )

  q_out, t_out = frame_updater(x, quats, trans, params)
  q_out, t_out = jax.block_until_ready((q_out, t_out))

  q_ref, t_ref = reference(x, quats, trans, params)
  err_q = float(jnp.max(jnp.abs(q_out - q_ref)))
  err_t = float(jnp.max(jnp.abs(t_out - t_ref)))
  assert jnp.allclose(q_out, q_ref, atol=5e-3, rtol=5e-3), f"quaternion max err = {err_q}"
  assert jnp.allclose(t_out, t_ref, atol=5e-3, rtol=5e-3), f"translation max err = {err_t}"

  print("KERNEL_OK")
</pallas_src>

<mosaic_0001>
module attributes {stable_mosaic.version = 11 : i64} {
  func.func @frame_updater_kernel(%arg0: i32, %arg1: i32, %arg2: memref<1x256x128xf32, #tpu.memory_space<vmem>>, %arg3: memref<1x4x256xf32, #tpu.memory_space<vmem>>, %arg4: memref<1x3x256xf32, #tpu.memory_space<vmem>>, %arg5: memref<1x128xf32, #tpu.memory_space<vmem>>, %arg6: memref<1x128xf32, #tpu.memory_space<vmem>>, %arg7: memref<128x128xf32, #tpu.memory_space<vmem>>, %arg8: memref<1x128xf32, #tpu.memory_space<vmem>>, %arg9: memref<1x4x256xf32, #tpu.memory_space<vmem>>, %arg10: memref<1x3x256xf32, #tpu.memory_space<vmem>>) attributes {dimension_semantics = [#tpu.dimension_semantics<parallel>, #tpu.dimension_semantics<parallel>], iteration_bounds = array<i64: 2, 1>, scalar_prefetch = 0 : i64, scratch_operands = 0 : i64, tpu.core_type = #tpu.core_type<tc>, window_params = [{transform_indices = @transform_0, window_bounds = array<i64: 1, 256, 128>}, {transform_indices = @transform_1, window_bounds = array<i64: 1, 4, 256>}, {transform_indices = @transform_2, window_bounds = array<i64: 1, 3, 256>}, {pipeline_mode = #tpu.pipeline_mode<synchronous>, transform_indices = @transform_3, window_bounds = array<i64: 1, 128>}, {pipeline_mode = #tpu.pipeline_mode<synchronous>, transform_indices = @transform_4, window_bounds = array<i64: 1, 128>}, {pipeline_mode = #tpu.pipeline_mode<synchronous>, transform_indices = @transform_5, window_bounds = array<i64: 128, 128>}, {pipeline_mode = #tpu.pipeline_mode<synchronous>, transform_indices = @transform_6, window_bounds = array<i64: 1, 128>}, {transform_indices = @transform_7, window_bounds = array<i64: 1, 4, 256>}, {transform_indices = @transform_8, window_bounds = array<i64: 1, 3, 256>}]} {
    %c0 = arith.constant 0 : index
    %c0_0 = arith.constant 0 : index
    %c0_1 = arith.constant 0 : index
    %0 = vector.load %arg2[%c0, %c0_0, %c0_1] : memref<1x256x128xf32, #tpu.memory_space<vmem>>, vector<1x256x128xf32>
    %1 = vector.shape_cast %0 : vector<1x256x128xf32> to vector<256x128xf32>
    %cst = arith.constant dense<0.000000e+00> : vector<256xf32>
    %2 = vector.multi_reduction <add>, %1, %cst [1] : vector<256x128xf32> to vector<256xf32>
    %3 = vector.shape_cast %2 : vector<256xf32> to vector<256x1xf32>
    %cst_2 = arith.constant 7.812500e-03 : f32
    %4 = vector.broadcast %cst_2 : f32 to vector<256x1xf32>
    %5 = arith.mulf %3, %4 : vector<256x1xf32>
    %6 = arith.mulf %1, %1 : vector<256x128xf32>
    %cst_3 = arith.constant dense<0.000000e+00> : vector<256xf32>
    %7 = vector.multi_reduction <add>, %6, %cst_3 [1] : vector<256x128xf32> to vector<256xf32>
    %8 = vector.shape_cast %7 : vector<256xf32> to vector<256x1xf32>
    %cst_4 = arith.constant 7.812500e-03 : f32
    %9 = vector.broadcast %cst_4 : f32 to vector<256x1xf32>
    %10 = arith.mulf %8, %9 : vector<256x1xf32>
    %11 = arith.mulf %5, %5 : vector<256x1xf32>
    %12 = arith.subf %10, %11 : vector<256x1xf32>
    %cst_5 = arith.constant 0.000000e+00 : f32
    %13 = vector.broadcast %cst_5 : f32 to vector<256x1xf32>
    %14 = arith.maximumf %12, %13 : vector<256x1xf32>
    %cst_6 = arith.constant 9.99999974E-6 : f32
    %15 = vector.broadcast %cst_6 : f32 to vector<256x1xf32>
    %16 = arith.addf %14, %15 : vector<256x1xf32>
    %17 = math.rsqrt %16 : vector<256x1xf32>
    %18 = vector.broadcast %5 : vector<256x1xf32> to vector<256x128xf32>
    %19 = arith.subf %1, %18 : vector<256x128xf32>
    %20 = vector.broadcast %17 : vector<256x1xf32> to vector<256x128xf32>
    %21 = arith.mulf %19, %20 : vector<256x128xf32>
    %c0_7 = arith.constant 0 : index
    %c0_8 = arith.constant 0 : index
    %22 = vector.load %arg5[%c0_7, %c0_8] : memref<1x128xf32, #tpu.memory_space<vmem>>, vector<1x128xf32>
    %23 = vector.broadcast %22 : vector<1x128xf32> to vector<256x128xf32>
    %24 = arith.mulf %21, %23 : vector<256x128xf32>
    %c0_9 = arith.constant 0 : index
    %c0_10 = arith.constant 0 : index
    %25 = vector.load %arg6[%c0_9, %c0_10] : memref<1x128xf32, #tpu.memory_space<vmem>>, vector<1x128xf32>
    %26 = vector.broadcast %25 : vector<1x128xf32> to vector<256x128xf32>
    %27 = arith.addf %24, %26 : vector<256x128xf32>
    %c0_11 = arith.constant 0 : index
    %c0_12 = arith.constant 0 : index
    %28 = vector.load %arg7[%c0_11, %c0_12] : memref<128x128xf32, #tpu.memory_space<vmem>>, vector<128x128xf32>
    %cst_13 = arith.constant dense<0.000000e+00> : vector<256x128xf32>
    %29 = tpu.matmul %27, %28, %cst_13 {dimension_numbers = #tpu.dot_dimension_numbers<[1], [0], [0], [1], [0, 0, 1, 1], [], []>, precision = #tpu.contract_precision<fp32>} : vector<256x128xf32>, vector<128x128xf32>, vector<256x128xf32> -> vector<256x128xf32>
    %c0_14 = arith.constant 0 : index
    %c0_15 = arith.constant 0 : index
    %30 = vector.load %arg8[%c0_14, %c0_15] : memref<1x128xf32, #tpu.memory_space<vmem>>, vector<1x128xf32>
    %31 = vector.broadcast %30 : vector<1x128xf32> to vector<256x128xf32>
    %32 = arith.addf %29, %31 : vector<256x128xf32>
    %33 = tpu.transpose %32, [1, 0] : vector<256x128xf32> -> vector<128x256xf32>
    %34 = vector.extract_strided_slice %33 {offsets = [0, 0], sizes = [1, 256], strides = [1, 1]} : vector<128x256xf32> to vector<1x256xf32>
    %35 = vector.extract_strided_slice %33 {offsets = [1, 0], sizes = [1, 256], strides = [1, 1]} : vector<128x256xf32> to vector<1x256xf32>
    %36 = vector.extract_strided_slice %33 {offsets = [2, 0], sizes = [1, 256], strides = [1, 1]} : vector<128x256xf32> to vector<1x256xf32>
    %37 = vector.extract_strided_slice %33 {offsets = [3, 0], sizes = [1, 256], strides = [1, 1]} : vector<128x256xf32> to vector<1x256xf32>
    %38 = vector.extract_strided_slice %33 {offsets = [4, 0], sizes = [1, 256], strides = [1, 1]} : vector<128x256xf32> to vector<1x256xf32>
    %39 = vector.extract_strided_slice %33 {offsets = [5, 0], sizes = [1, 256], strides = [1, 1]} : vector<128x256xf32> to vector<1x256xf32>
    %40 = arith.mulf %34, %34 : vector<1x256xf32>
    %cst_16 = arith.constant 1.000000e+00 : f32
    %41 = vector.broadcast %cst_16 : f32 to vector<1x256xf32>
    %42 = arith.addf %41, %40 : vector<1x256xf32>
    %43 = arith.mulf %35, %35 : vector<1x256xf32>
    %44 = arith.addf %42, %43 : vector<1x256xf32>
    %45 = arith.mulf %36, %36 : vector<1x256xf32>
    %46 = arith.addf %44, %45 : vector<1x256xf32>
    %47 = math.rsqrt %46 : vector<1x256xf32>
    %48 = arith.mulf %34, %47 : vector<1x256xf32>
    %49 = arith.mulf %35, %47 : vector<1x256xf32>
    %50 = arith.mulf %36, %47 : vector<1x256xf32>
    %c0_17 = arith.constant 0 : index
    %c0_18 = arith.constant 0 : index
    %c0_19 = arith.constant 0 : index
    %51 = vector.load %arg3[%c0_17, %c0_18, %c0_19] : memref<1x4x256xf32, #tpu.memory_space<vmem>>, vector<1x4x256xf32>
    %52 = vector.shape_cast %51 : vector<1x4x256xf32> to vector<4x256xf32>
    %53 = vector.extract_strided_slice %52 {offsets = [0, 0], sizes = [1, 256], strides = [1, 1]} : vector<4x256xf32> to vector<1x256xf32>
    %54 = vector.extract_strided_slice %52 {offsets = [1, 0], sizes = [1, 256], strides = [1, 1]} : vector<4x256xf32> to vector<1x256xf32>
    %55 = vector.extract_strided_slice %52 {offsets = [2, 0], sizes = [1, 256], strides = [1, 1]} : vector<4x256xf32> to vector<1x256xf32>
    %56 = vector.extract_strided_slice %52 {offsets = [3, 0], sizes = [1, 256], strides = [1, 1]} : vector<4x256xf32> to vector<1x256xf32>
    %57 = arith.mulf %53, %53 : vector<1x256xf32>
    %58 = arith.mulf %54, %54 : vector<1x256xf32>
    %59 = arith.addf %57, %58 : vector<1x256xf32>
    %60 = arith.mulf %55, %55 : vector<1x256xf32>
    %61 = arith.addf %59, %60 : vector<1x256xf32>
    %62 = arith.mulf %56, %56 : vector<1x256xf32>
    %63 = arith.addf %61, %62 : vector<1x256xf32>
    %cst_20 = arith.constant 2.000000e+00 : f32
    %64 = vector.broadcast %cst_20 : f32 to vector<1x256xf32>
    %65 = arith.divf %64, %63 : vector<1x256xf32>
    %66 = arith.mulf %55, %55 : vector<1x256xf32>
    %67 = arith.mulf %56, %56 : vector<1x256xf32>
    %68 = arith.addf %66, %67 : vector<1x256xf32>
    %69 = arith.mulf %65, %68 : vector<1x256xf32>
    %cst_21 = arith.constant 1.000000e+00 : f32
    %70 = vector.broadcast %cst_21 : f32 to vector<1x256xf32>
    %71 = arith.subf %70, %69 : vector<1x256xf32>
    %72 = arith.mulf %54, %55 : vector<1x256xf32>
    %73 = arith.mulf %56, %53 : vector<1x256xf32>
    %74 = arith.subf %72, %73 : vector<1x256xf32>
    %75 = arith.mulf %65, %74 : vector<1x256xf32>
    %76 = arith.mulf %54, %56 : vector<1x256xf32>
    %77 = arith.mulf %55, %53 : vector<1x256xf32>
    %78 = arith.addf %76, %77 : vector<1x256xf32>
    %79 = arith.mulf %65, %78 : vector<1x256xf32>
    %80 = arith.mulf %54, %55 : vector<1x256xf32>
    %81 = arith.mulf %56, %53 : vector<1x256xf32>
    %82 = arith.addf %80, %81 : vector<1x256xf32>
    %83 = arith.mulf %65, %82 : vector<1x256xf32>
    %84 = arith.mulf %54, %54 : vector<1x256xf32>
    %85 = arith.mulf %56, %56 : vector<1x256xf32>
    %86 = arith.addf %84, %85 : vector<1x256xf32>
    %87 = arith.mulf %65, %86 : vector<1x256xf32>
    %cst_22 = arith.constant 1.000000e+00 : f32
    %88 = vector.broadcast %cst_22 : f32 to vector<1x256xf32>
    %89 = arith.subf %88, %87 : vector<1x256xf32>
    %90 = arith.mulf %55, %56 : vector<1x256xf32>
    %91 = arith.mulf %54, %53 : vector<1x256xf32>
    %92 = arith.subf %90, %91 : vector<1x256xf32>
    %93 = arith.mulf %65, %92 : vector<1x256xf32>
    %94 = arith.mulf %54, %56 : vector<1x256xf32>
    %95 = arith.mulf %55, %53 : vector<1x256xf32>
    %96 = arith.subf %94, %95 : vector<1x256xf32>
    %97 = arith.mulf %65, %96 : vector<1x256xf32>
    %98 = arith.mulf %55, %56 : vector<1x256xf32>
    %99 = arith.mulf %54, %53 : vector<1x256xf32>
    %100 = arith.addf %98, %99 : vector<1x256xf32>
    %101 = arith.mulf %65, %100 : vector<1x256xf32>
    %102 = arith.mulf %54, %54 : vector<1x256xf32>
    %103 = arith.mulf %55, %55 : vector<1x256xf32>
    %104 = arith.addf %102, %103 : vector<1x256xf32>
    %105 = arith.mulf %65, %104 : vector<1x256xf32>
    %cst_23 = arith.constant 1.000000e+00 : f32
    %106 = vector.broadcast %cst_23 : f32 to vector<1x256xf32>
    %107 = arith.subf %106, %105 : vector<1x256xf32>
    %108 = arith.mulf %53, %47 : vector<1x256xf32>
    %109 = arith.mulf %54, %48 : vector<1x256xf32>
    %110 = arith.subf %108, %109 : vector<1x256xf32>
    %111 = arith.mulf %55, %49 : vector<1x256xf32>
    %112 = arith.subf %110, %111 : vector<1x256xf32>
    %113 = arith.mulf %56, %50 : vector<1x256xf32>
    %114 = arith.subf %112, %113 : vector<1x256xf32>
    %c0_24 = arith.constant 0 : index
    %c0_25 = arith.constant 0 : index
    %c0_26 = arith.constant 0 : index
    %115 = vector.load %arg9[%c0_24, %c0_25, %c0_26] : memref<1x4x256xf32, #tpu.memory_space<vmem>>, vector<1x1x256xf32>
    %116 = vector.shape_cast %115 : vector<1x1x256xf32> to vector<1x256xf32>
    %117 = vector.shape_cast %114 : vector<1x256xf32> to vector<1x1x256xf32>
    tpu.vector_store %arg9[%c0_24, %c0_25, %c0_26], %117 {strides = array<i32>} : memref<1x4x256xf32, #tpu.memory_space<vmem>>, vector<1x1x256xf32>,
    %118 = arith.mulf %53, %48 : vector<1x256xf32>
    %119 = arith.mulf %54, %47 : vector<1x256xf32>
    %120 = arith.addf %118, %119 : vector<1x256xf32>
    %121 = arith.mulf %55, %50 : vector<1x256xf32>
    %122 = arith.addf %120, %121 : vector<1x256xf32>
    %123 = arith.mulf %56, %49 : vector<1x256xf32>
    %124 = arith.subf %122, %123 : vector<1x256xf32>
    %c0_27 = arith.constant 0 : index
    %c1 = arith.constant 1 : index
    %c0_28 = arith.constant 0 : index
    %125 = vector.load %arg9[%c0_27, %c1, %c0_28] : memref<1x4x256xf32, #tpu.memory_space<vmem>>, vector<1x1x256xf32>
    %126 = vector.shape_cast %125 : vector<1x1x256xf32> to vector<1x256xf32>
    %127 = vector.shape_cast %124 : vector<1x256xf32> to vector<1x1x256xf32>
    tpu.vector_store %arg9[%c0_27, %c1, %c0_28], %127 {strides = array<i32>} : memref<1x4x256xf32, #tpu.memory_space<vmem>>, vector<1x1x256xf32>,
    %128 = arith.mulf %53, %49 : vector<1x256xf32>
    %129 = arith.mulf %54, %50 : vector<1x256xf32>
    %130 = arith.subf %128, %129 : vector<1x256xf32>
    %131 = arith.mulf %55, %47 : vector<1x256xf32>
    %132 = arith.addf %130, %131 : vector<1x256xf32>
    %133 = arith.mulf %56, %48 : vector<1x256xf32>
    %134 = arith.addf %132, %133 : vector<1x256xf32>
    %c0_29 = arith.constant 0 : index
    %c2 = arith.constant 2 : index
    %c0_30 = arith.constant 0 : index
    %135 = vector.load %arg9[%c0_29, %c2, %c0_30] : memref<1x4x256xf32, #tpu.memory_space<vmem>>, vector<1x1x256xf32>
    %136 = vector.shape_cast %135 : vector<1x1x256xf32> to vector<1x256xf32>
    %137 = vector.shape_cast %134 : vector<1x256xf32> to vector<1x1x256xf32>
    tpu.vector_store %arg9[%c0_29, %c2, %c0_30], %137 {strides = array<i32>} : memref<1x4x256xf32, #tpu.memory_space<vmem>>, vector<1x1x256xf32>,
    %138 = arith.mulf %53, %50 : vector<1x256xf32>
    %139 = arith.mulf %54, %49 : vector<1x256xf32>
    %140 = arith.addf %138, %139 : vector<1x256xf32>
    %141 = arith.mulf %55, %48 : vector<1x256xf32>
    %142 = arith.subf %140, %141 : vector<1x256xf32>
    %143 = arith.mulf %56, %47 : vector<1x256xf32>
    %144 = arith.addf %142, %143 : vector<1x256xf32>
    %c0_31 = arith.constant 0 : index
    %c3 = arith.constant 3 : index
    %c0_32 = arith.constant 0 : index
    %145 = vector.load %arg9[%c0_31, %c3, %c0_32] : memref<1x4x256xf32, #tpu.memory_space<vmem>>, vector<1x1x256xf32>
    %146 = vector.shape_cast %145 : vector<1x1x256xf32> to vector<1x256xf32>
    %147 = vector.shape_cast %144 : vector<1x256xf32> to vector<1x1x256xf32>
    tpu.vector_store %arg9[%c0_31, %c3, %c0_32], %147 {strides = array<i32>} : memref<1x4x256xf32, #tpu.memory_space<vmem>>, vector<1x1x256xf32>,
    %c0_33 = arith.constant 0 : index
    %c0_34 = arith.constant 0 : index
    %c0_35 = arith.constant 0 : index
    %148 = vector.load %arg4[%c0_33, %c0_34, %c0_35] : memref<1x3x256xf32, #tpu.memory_space<vmem>>, vector<1x3x256xf32>
    %149 = vector.shape_cast %148 : vector<1x3x256xf32> to vector<3x256xf32>
    %150 = arith.mulf %71, %37 : vector<1x256xf32>
    %151 = arith.mulf %75, %38 : vector<1x256xf32>
    %152 = arith.addf %150, %151 : vector<1x256xf32>
    %153 = arith.mulf %79, %39 : vector<1x256xf32>
    %154 = arith.addf %152, %153 : vector<1x256xf32>
    %155 = vector.extract_strided_slice %149 {offsets = [0, 0], sizes = [1, 256], strides = [1, 1]} : vector<3x256xf32> to vector<1x256xf32>
    %156 = arith.addf %154, %155 : vector<1x256xf32>
    %c0_36 = arith.constant 0 : index
    %c0_37 = arith.constant 0 : index
    %c0_38 = arith.constant 0 : index
    %157 = vector.load %arg10[%c0_36, %c0_37, %c0_38] : memref<1x3x256xf32, #tpu.memory_space<vmem>>, vector<1x1x256xf32>
    %158 = vector.shape_cast %157 : vector<1x1x256xf32> to vector<1x256xf32>
    %159 = vector.shape_cast %156 : vector<1x256xf32> to vector<1x1x256xf32>
    tpu.vector_store %arg10[%c0_36, %c0_37, %c0_38], %159 {strides = array<i32>} : memref<1x3x256xf32, #tpu.memory_space<vmem>>, vector<1x1x256xf32>,
    %160 = arith.mulf %83, %37 : vector<1x256xf32>
    %161 = arith.mulf %89, %38 : vector<1x256xf32>
    %162 = arith.addf %160, %161 : vector<1x256xf32>
    %163 = arith.mulf %93, %39 : vector<1x256xf32>
    %164 = arith.addf %162, %163 : vector<1x256xf32>
    %165 = vector.extract_strided_slice %149 {offsets = [1, 0], sizes = [1, 256], strides = [1, 1]} : vector<3x256xf32> to vector<1x256xf32>
    %166 = arith.addf %164, %165 : vector<1x256xf32>
    %c0_39 = arith.constant 0 : index
    %c1_40 = arith.constant 1 : index
    %c0_41 = arith.constant 0 : index
    %167 = vector.load %arg10[%c0_39, %c1_40, %c0_41] : memref<1x3x256xf32, #tpu.memory_space<vmem>>, vector<1x1x256xf32>
    %168 = vector.shape_cast %167 : vector<1x1x256xf32> to vector<1x256xf32>
    %169 = vector.shape_cast %166 : vector<1x256xf32> to vector<1x1x256xf32>
    tpu.vector_store %arg10[%c0_39, %c1_40, %c0_41], %169 {strides = array<i32>} : memref<1x3x256xf32, #tpu.memory_space<vmem>>, vector<1x1x256xf32>,
    %170 = arith.mulf %97, %37 : vector<1x256xf32>
    %171 = arith.mulf %101, %38 : vector<1x256xf32>
    %172 = arith.addf %170, %171 : vector<1x256xf32>
    %173 = arith.mulf %107, %39 : vector<1x256xf32>
    %174 = arith.addf %172, %173 : vector<1x256xf32>
    %175 = vector.extract_strided_slice %149 {offsets = [2, 0], sizes = [1, 256], strides = [1, 1]} : vector<3x256xf32> to vector<1x256xf32>
    %176 = arith.addf %174, %175 : vector<1x256xf32>
    %c0_42 = arith.constant 0 : index
    %c2_43 = arith.constant 2 : index
    %c0_44 = arith.constant 0 : index
    %177 = vector.load %arg10[%c0_42, %c2_43, %c0_44] : memref<1x3x256xf32, #tpu.memory_space<vmem>>, vector<1x1x256xf32>
    %178 = vector.shape_cast %177 : vector<1x1x256xf32> to vector<1x256xf32>
    %179 = vector.shape_cast %176 : vector<1x256xf32> to vector<1x1x256xf32>
    tpu.vector_store %arg10[%c0_42, %c2_43, %c0_44], %179 {strides = array<i32>} : memref<1x3x256xf32, #tpu.memory_space<vmem>>, vector<1x1x256xf32>,
    return
  }
  func.func @transform_0(%arg0: i32, %arg1: i32) -> (i32, i32, i32) {
    %c0_i32 = arith.constant 0 : i32
    %c0_i32_0 = arith.constant 0 : i32
    return %arg0, %arg1, %c0_i32 : i32, i32, i32
  }
  func.func @transform_1(%arg0: i32, %arg1: i32) -> (i32, i32, i32) {
    %c0_i32 = arith.constant 0 : i32
    %c0_i32_0 = arith.constant 0 : i32
    return %arg0, %c0_i32, %arg1 : i32, i32, i32
  }
  func.func @transform_2(%arg0: i32, %arg1: i32) -> (i32, i32, i32) {
    %c0_i32 = arith.constant 0 : i32
    %c0_i32_0 = arith.constant 0 : i32
    return %arg0, %c0_i32, %arg1 : i32, i32, i32
  }
  func.func @transform_3(%arg0: i32, %arg1: i32) -> (i32, i32) {
    %c0_i32 = arith.constant 0 : i32
    %c0_i32_0 = arith.constant 0 : i32
    %c0_i32_1 = arith.constant 0 : i32
    return %c0_i32, %c0_i32_0 : i32, i32
  }
  func.func @transform_4(%arg0: i32, %arg1: i32) -> (i32, i32) {
    %c0_i32 = arith.constant 0 : i32
    %c0_i32_0 = arith.constant 0 : i32
    %c0_i32_1 = arith.constant 0 : i32
    return %c0_i32, %c0_i32_0 : i32, i32
  }
  func.func @transform_5(%arg0: i32, %arg1: i32) -> (i32, i32) {
    %c0_i32 = arith.constant 0 : i32
    %c0_i32_0 = arith.constant 0 : i32
    %c0_i32_1 = arith.constant 0 : i32
    return %c0_i32, %c0_i32_0 : i32, i32
  }
  func.func @transform_6(%arg0: i32, %arg1: i32) -> (i32, i32) {
    %c0_i32 = arith.constant 0 : i32
    %c0_i32_0 = arith.constant 0 : i32
    %c0_i32_1 = arith.constant 0 : i32
    return %c0_i32, %c0_i32_0 : i32, i32
  }
  func.func @transform_7(%arg0: i32, %arg1: i32) -> (i32, i32, i32) {
    %c0_i32 = arith.constant 0 : i32
    %c0_i32_0 = arith.constant 0 : i32
    return %arg0, %c0_i32, %arg1 : i32, i32, i32
  }
  func.func @transform_8(%arg0: i32, %arg1: i32) -> (i32, i32, i32) {
    %c0_i32 = arith.constant 0 : i32
    %c0_i32_0 = arith.constant 0 : i32
    return %arg0, %c0_i32, %arg1 : i32, i32, i32
  }
}

</mosaic_0001>

<bundles_post_ra>
// kernel: tpu_custom_call.1
= control target key start
LH: loop header
LB: loop body
LE: loop exit
PB: predicated region body
PF: predicated region fallthrough
CT: control target
= control target key end

     0   :  { %s6867_s0 = inlined_call_operand.hbm [shape: f32[2,256,128], index: 0, kind: input, shape index: {}]   ;;  %s6868_s1 = inlined_call_operand.vmem [shape: f32[2,4,256], index: 1, kind: input, shape index: {}]   ;;  %s6869_s2 = inlined_call_operand.vmem [shape: f32[2,3,256], index: 2, kind: input, shape index: {}]   ;;  %s6870_s3 = inlined_call_operand.vmem [shape: f32[1,128], index: 3, kind: input, shape index: {}]   ;;  %s6871_s4 = inlined_call_operand.vmem [shape: f32[1,128], index: 4, kind: input, shape index: {}]   ;;  %s6872_s5 = inlined_call_operand.hbm [shape: f32[128,128], index: 5, kind: input, shape index: {}]   ;;  %s6873_s6 = inlined_call_operand.vmem [shape: f32[1,128], index: 6, kind: input, shape index: {}]   ;;  %s6874_s7 = inlined_call_operand.hbm [shape: f32[2,4,256], index: 7, kind: output, shape index: {0}]   ;;  %s6875_s8 = inlined_call_operand.vmem [shape: f32[2,3,256], index: 8, kind: output, shape index: {1}]  }
   0x1   :  { %6952 = sst [smem:[#allocation57_spill]] %s6872_s5 }
   0x2   :  { %14 = vsyncpa [#allocation3], 0 }
   0x3   :  { %16 = vsyncpa [#allocation3 + $0x1], 0 }
   0x4   :  { %17 = vsyncpa [#allocation6], 0 }
   0x5   :  { %18 = vsyncpa [#allocation4], 0 }
   0x6   :  { %20 = vsyncpa [#allocation4 + $0x1], 0  ;;  %s5260_s27 = smov 0   ;;  %s5262_s28 = smov 0  }
   0x7   :  { %s5264_s29 = smov 0   ;;  %s5266_s30 = smov 0  }
   0x8   :  { %s5268_s9 = smov 0   ;;  %s5270_s10 = smov 0  }
   0x9 LB: > { %s3687_s11 = sadd.s32 4294967295, %s5207_s10   ;;  %s3688_s12 = sadd.s32 4294967294, %s5207_s10   ;;  %s5207_s10 = sphi %s5270_s10, %s26_s10   ;;  %s5203_s9 = sphi %s5268_s9, %s7110_s9   ;;  %s5199_s30 = sphi %s5266_s30, %s7109_s30   ;;  %s5195_s29 = sphi %s5264_s29, %s7108_s29   ;;  %s5191_s28 = sphi %s5262_s28, %s7107_s28   ;;  %s5187_s27 = sphi %s5260_s27, %s7106_s27  }
   0xa   : > { %p60_p0 = scmp.ne.s32.totalorder %s5191_s28, %s5187_s27  ;;  %p5294_p1 = scmp.eq.s32.totalorder %s3687_s11, 0 }
   0xb   : > { %p5298_p2 = scmp.eq.s32.totalorder %s3687_s11, 1  ;;  %p232_p3 = scmp.eq.s32.totalorder %s3688_s12, 1 }
   0xc   : > { %s6953_s13 = scalar_select %p5294_p1, 1, 0 }
   0xd   : > { %s6954_s14 = scalar_select %p5298_p2, 1, 0 }
   0xe   : > { %p5304_p4 = por %p5294_p1, %p60_p0  ;;  %p3689_p5 = scmp.ge.s32.totalorder %s5207_s10, 1 }
   0xf   : > { %p5309_p6 = por %p232_p3, %p60_p0  ;;  %p267_p7 = scmp.lt.s32.totalorder %s5207_s10, 3 }
  0x10   : > { %s6955_s15 = scalar_select %p5304_p4, 1, 0 }
  0x11   : > { %s6956_s16 = scalar_select %p5309_p6, 1, 0 }
  0x12   : > { %p5314_p8 = pnand %p3689_p5, %p267_p7  ;;  %s5209_s18 = smov [#allocation5]  }
  0x13   : > { %6957 = sst [smem:[#allocation11_spill]] %s6956_s16  ;;  %s285_s19 = sshll.u32 %s5209_s18, 4  ;;  %s286_s19 = int_to_ptr.vmem [resolvable:$true] %s285_s19 }
  0x14   : > { %s6958_s17 = scalar_select %p5314_p8, 1, 0 }
  0x15   : > { %p4911_p9 = pneg %p5314_p8  ;;  %s38_s21 = sadd.s32 1, %s5203_s9 }
  0x16   : > { %s6960_s5 = sld [smem:[#allocation57_spill]] }
  0x17   : > { %p5323_p11 = pnand %p4911_p9, %p5294_p1 }
  0x19   : > { %p5065_p13 = pneg %p5323_p11 }
  0x1c   : > { %s5063_s24 = scalar_lea.hbm %s6960_s5, 2048 }
  0x1d   : > { %p5064_p12 = scmp.ne.s32.totalorder %s6960_s5, %s5063_s24  ;;  %p5070_p5 = scmp.lt.u32.totalorder %s5063_s24, %s6960_s5 }
  0x1f   : > { %p5066_p0 = pnand %p5065_p13, %p5064_p12 }
  0x21   : > { %p5067_p3 = pneg %p5066_p0 }
  0x23   : > { %p5072_p7 = pnand %p5070_p5, %p5067_p3 }
  0x25   : > { %5075 = shalt.err (!%p5072_p7)
}
  0x26   : > { %s5076_s18 = scalar_lea.vmem %s286_s19, 2048  ;;  %p5084_p1 = scmp.lt.s32.totalorder %s286_s19, %s286_s19 }
  0x27   : > { %p5077_p9 = scmp.ne.s32.totalorder %s286_s19, %s5076_s18  ;;  %p5085_p4 = scmp.lt.s32.totalorder %s5076_s18, %s5076_s18 }
  0x29   : > { %p5079_p10 = pnand %p5077_p9, %p5065_p13  ;;  %p5086_p8 = por %p5085_p4, %p5084_p1 }
  0x2b   : > { %p5080_p6 = pneg %p5079_p10 }
  0x2d   : > { %p5087_p2 = pnand %p5086_p8, %p5080_p6 }
  0x2f   : > { %5090 = shalt.err (!%p5087_p2)
}
  0x30   : > { %s6880_s22 = smov 128   ;;  %s6881_s23 = smov 8  }
  0x31   : > { %4914 = dma.hbm_to_vmem [thread:$0]  (!%p5323_p11), %s6960_s5, 2048, %s286_s19, [#allocation6], %s6880_s22, %s6880_s22, %s6881_s23  }
  0x32   : > { %p40_p1 = scmp.ge.s32.totalorder %s38_s21, 2  ;;  %s47_s26 = sadd.s32 1, %s5195_s29 }
  0x33   : > { %p54_p2 = scmp.ne.s32.totalorder %s5195_s29, %s5191_s28  ;;  %p55_p4 = scmp.eq.s32.totalorder %s5207_s10, 0 }
  0x34   : > { %s7112_s21 = smov (%p40_p1, %s38_s21), 0  ;;  %p6962_p8 = scmp.ne.s32.totalorder %s6954_s14, 0 }
  0x35   : > { %p5353_p6 = por %p55_p4, %p54_p2  ;;  %s42_s12 = ssub.s32 %s5203_s9, %s7112_s21 }
  0x36   : > { %p5359_p10 = por %p6962_p8, %p54_p2  ;;  %p4924_p12 = scmp.lt.s32.totalorder %s5207_s10, 2 }
  0x37   : > { %p45_p11 = scmp.eq.s32.totalorder %s42_s12, 0  ;;  %s302_s19 = sand.u32 1, %s5195_s29  }
  0x38   : > { %s3692_s18 = sshll.u32 %s302_s19, 8  ;;  %s3746_s25 = sshll.u32 %s5203_s9, 12 }
  0x39   : > { %s5368_s24 = scalar_select %p45_p11, %s5195_s29, %s47_s26  }
  0x3a   : > { %s5374_s5 = scalar_lea.hbm %s6867_s0, %s3746_s25  ;;  %s306_s14 = scalar_lea.vmem [#allocation2], %s3692_s18 }
  0x3b   : > { %s315_s16 = sshll.u32 %s306_s14, 4  ;;  %p5380_p13 = pnand %p4924_p12, %p5353_p6  ;;  %s5376_s16 = int_to_ptr.vmem [resolvable:$true] %s315_s16 }
  0x3c   : > { %s5384_s26 = scalar_lea.sflag [#allocation3], %s302_s19  ;;  %s5091_s22 = scalar_lea.hbm %s5374_s5, 4096 }
  0x3d   : > { %p5092_p0 = scmp.ne.s32.totalorder %s5374_s5, %s5091_s22  ;;  %p5093_p3 = pneg %p5380_p13 }
  0x3e   : > { %s5096_s11 = scalar_lea.hbm %s6867_s0, 8192  ;;  %p5097_p9 = scmp.lt.u32.totalorder %s5374_s5, %s6867_s0 }
  0x3f   : > { %p5094_p5 = pnand %p5093_p3, %p5092_p0  ;;  %p5098_p1 = scmp.lt.u32.totalorder %s5096_s11, %s5091_s22 }
  0x40   : > { %p5100_p4 = scmp.lt.u32.totalorder %s5091_s22, %s5374_s5 }
  0x41   : > { %p5095_p7 = pneg %p5094_p5  ;;  %p5099_p2 = por %p5098_p1, %p5097_p9 }
  0x43   : > { %p5101_p6 = por %p5100_p4, %p5099_p2 }
  0x45   : > { %p5102_p8 = pnand %p5101_p6, %p5095_p7 }
  0x47   : > { %5105 = shalt.err (!%p5102_p8)
}
  0x48   : > { %s5106_s19 = scalar_lea.vmem %s5376_s16, 4096  ;;  %s5212_s23 = smov [#allocation2]  }
  0x49   : > { %p5107_p12 = scmp.ne.s32.totalorder %s5376_s16, %s5106_s19  ;;  %s5111_s18 = sshll.u32 %s5212_s23, 4  ;;  %s5112_s18 = int_to_ptr.vmem [resolvable:$false] %s5111_s18 }
  0x4a   : > { %s5113_s25 = scalar_lea.vmem %s5112_s18, 8192  ;;  %p5114_p5 = scmp.lt.s32.totalorder %s5376_s16, %s5112_s18 }
  0x4b   : > { %p5109_p11 = pnand %p5107_p12, %p5093_p3  ;;  %p5115_p9 = scmp.lt.s32.totalorder %s5113_s25, %s5106_s19 }
  0x4d   : > { %p5110_p0 = pneg %p5109_p11  ;;  %p5116_p1 = por %p5115_p9, %p5114_p5 }
  0x4f   : > { %p5117_p2 = pnand %p5116_p1, %p5110_p0 }
  0x51   : > { %5120 = shalt.err (!%p5117_p2)
}
  0x52   : > { %s6965_s22 = smov 8   ;;  %s6966_s11 = smov 128  }
  0x53   : > { %4918 = dma.hbm_to_vmem [thread:$0]  (!%p5380_p13), %s5374_s5, 4096, %s5376_s16, %s5384_s26, %s6966_s11, %s6966_s11, %s6965_s22  }
  0x54   : > { %p6967_p3 = scmp.ne.s32.totalorder %s6958_s17, 0 }
  0x56   : > { %353 = sbr.rel (%p6967_p3) target bundleno = 909 (0x38d), region = 48 }
  0x5d   : > { %s5418_s14 = sand.u32 1, %s5191_s28   ;;  %p6968_p7 = scmp.ne.s32.totalorder %s6955_s15, 0 }
  0x5e   : > { %s3696_s19 = sshll.u32 %s5418_s14, 8  ;;  %s356_s23 = scalar_lea.sflag [#allocation3], %s5418_s14 }
  0x5f   : > { %s5422_s18 = scalar_lea.vmem [#allocation2], %s3696_s19 }
  0x60   : > { %5174 = dma.done.wait (%p6968_p7), %s356_s23, 4096  }
  0x61   : > { %5176 = vsyncadd (%p6968_p7), %s356_s23, 4294963200  ;;  %p6969_p13 = scmp.ne.s32.totalorder %s6953_s13, 0 }
  0x63   : > { %5178 = dma.done.wait (%p6969_p13), [#allocation6], 2048  }
  0x64   : > { %5180 = vsyncadd (%p6969_p13), [#allocation6], 4294965248  ;;  %v5433_v0 = vld [vmem:[%s5422_s18 + $0x18] sm:$0xff]  ;;  %v5436_v1 = vld [vmem:[%s5422_s18] sm:$0xff]  ;;  %p425_p4 = scmp.lt.s32.totalorder %s5199_s30, 1  ;;  %s3698_s22 = sshll.u32 %s5418_s14, 3 }
  0x65   : > { %493 = vadd.xlane.f32.xlu1 %v5433_v0  ;;  %487 = vadd.xlane.f32.xlu0 %v5436_v1  ;;  %v583_v2 = vmul.f32 %v5436_v1, %v5436_v1  ;;  %v5443_v3 = vld [vmem:[%s5422_s18 + $0x8] sm:$0xff]  ;;  %v5449_v5 = vld [vmem:[%s5422_s18 + $0x10] sm:$0xff]  ;;  %v586_v7 = vmul.f32 %v5433_v0, %v5433_v0  ;;  %v5457_v8 = vld [vmem:[%s5422_s18 + $0x20] sm:$0xff]  ;;  %s411_s11 = scalar_lea.vmem [#allocation7], %s3698_s22  ;;  %s5214_s16 = smov [#allocation7]  }
  0x66   : > { %v584_v4 = vmul.f32 %v5443_v3, %v5443_v3  ;;  %v585_v6 = vmul.f32 %v5449_v5, %v5449_v5  ;;  %v5460_v9 = vld [vmem:[%s5422_s18 + $0x28] sm:$0xff]  ;;  %v587_v10 = vmul.f32 %v5457_v8, %v5457_v8  ;;  %v5468_v12 = vld [vmem:[#allocation5] sm:$0xff]  ;;  %v5480_v17 = vld [vmem:[#allocation5 + $0x10] sm:$0xff]  ;;  %s426_s19 = scalar_select %p425_p4, %s5199_s30, 1 }
  0x67   : > { %v588_v11 = vmul.f32 %v5460_v9, %v5460_v9  ;;  %v5470_v13 = vld [vmem:[#allocation5 + $0x8] sm:$0xff]  ;;  %v1037_v14 = vand.u32 4294901760, %v5468_v12  ;;  %v5482_v18 = vld [vmem:[#allocation5 + $0x18] sm:$0xff]  ;;  %v5485_v19 = vld [vmem:[%s5422_s18 + $0x30] sm:$0xff]  ;;  %v1043_v21 = vand.u32 4294901760, %v5480_v17 }
  0x68   : > { %v1040_v15 = vand.u32 4294901760, %v5470_v13  ;;  %v5488_v20 = vld [vmem:[%s5422_s18 + $0x38] sm:$0xff]  ;;  %v1046_v22 = vand.u32 4294901760, %v5482_v18  ;;  %v589_v24 = vmul.f32 %v5485_v19, %v5485_v19  ;;  %v5510_v26 = vld [vmem:[#allocation5 + $0x20] sm:$0xff]  ;;  %v5512_v27 = vld [vmem:[#allocation5 + $0x28] sm:$0xff]  ;;  %s6717_s23 = sshll.u32 %s426_s19, 3 }
  0x69   : > { %489 = vadd.xlane.f32.xlu0 %v5443_v3  ;;  %615 = vadd.xlane.f32.xlu1 %v583_v2  ;;  %v590_v25 = vmul.f32 %v5488_v20, %v5488_v20  ;;  %v1049_v28 = vand.u32 4294901760, %v5510_v26  ;;  %v1052_v29 = vand.u32 4294901760, %v5512_v27  ;;  %v5519_v30 = vld [vmem:[%s5422_s18 + $0x40] sm:$0xff]  ;;  %v5528_v32 = vld [vmem:[%s5422_s18 + $0x48] sm:$0xff]  ;;  %v5530_v33 = vld [vmem:[#allocation5 + $0x30] sm:$0xff]  ;;  %s432_s13 = scalar_lea.vmem %s6868_s1, %s6717_s23  ;;  %s442_s17 = scalar_lea.vmem %s6869_s2, %s6717_s23 }
  0x6a   : > { %v5478_v16 = vpack.c.bf16 %v1040_v15, %v1037_v14  ;;  %v5500_v23 = vpack.c.bf16 %v1046_v22, %v1043_v21  ;;  %v5532_v34 = vld [vmem:[#allocation5 + $0x38] sm:$0xff]  ;;  %v1055_v35 = vand.u32 4294901760, %v5530_v33  ;;  %v591_v37 = vmul.f32 %v5519_v30, %v5519_v30  ;;  %v5552_v40 = vld [vmem:[#allocation5 + $0x40] sm:$0xff]  ;;  %v5554_v41 = vld [vmem:[#allocation5 + $0x48] sm:$0xff]  ;;  %s453_s25 = scalar_lea.vmem %s6875_s8, %s6717_s23  ;;  %s3750_s19 = sshll.u32 %s5199_s30, 7 }
  0x6b   : > { %v5525_v31 = vpack.c.bf16 %v1052_v29, %v1049_v28  ;;  %v6891_v36 = vand.u32 4294901760, %v5532_v34  ;;  %v592_v38 = vmul.f32 %v5528_v32, %v5528_v32  ;;  %v6890_v42 = vand.u32 4294901760, %v5552_v40  ;;  %v5563_v44 = vld [vmem:[%s5422_s18 + $0x50] sm:$0xff]  ;;  %v5572_v46 = vld [vmem:[%s5422_s18 + $0x58] sm:$0xff]  ;;  %v5596_v54 = vld [vmem:[#allocation5 + $0x60] sm:$0xff]  ;;  %s3516_s23 = sshll.u32 %s411_s11, 4  ;;  %s6818_s23 = int_to_ptr.vmem [resolvable:$true] %s3516_s23 }
  0x6c   : > { %6970 = vst [vmem:[#allocation12_spill] sm:$0xff] %v5478_v16  ;;  %4616 = vmatprep.subr.bf16.mxu0 %v5478_v16  ;;  %4520 = vmatprep.subr.bf16.mxu1 %v5478_v16  ;;  %6971 = vst [vmem:[#allocation13_spill] sm:$0xff] %v5500_v23  ;;  %v6889_v43 = vand.u32 4294901760, %v5554_v41  ;;  %v5574_v47 = vld [vmem:[#allocation5 + $0x50] sm:$0xff]  ;;  %v5576_v48 = vld [vmem:[#allocation5 + $0x58] sm:$0xff]  ;;  %v593_v51 = vmul.f32 %v5563_v44, %v5563_v44  ;;  %v594_v52 = vmul.f32 %v5572_v46, %v5572_v46  ;;  %s3491_s30 = scalar_lea.sflag [#allocation4], %s5418_s14 }
  0x6d   : > { %491 = vadd.xlane.f32.xlu0 %v5449_v5  ;;  %617 = vadd.xlane.f32.xlu1 %v584_v4  ;;  %6972 = vst [vmem:[#allocation14_spill] sm:$0xff] %v5525_v31  ;;  %v5550_v39 = vpack.c.bf16 %v6891_v36, %v1055_v35  ;;  %v6888_v49 = vand.u32 4294901760, %v5574_v47  ;;  %v6887_v50 = vand.u32 4294901760, %v5576_v48  ;;  %v5598_v55 = vld [vmem:[#allocation5 + $0x68] sm:$0xff]  ;;  %v6886_v56 = vand.u32 4294901760, %v5596_v54  ;;  %v5607_v58 = vld [vmem:[%s5422_s18 + $0x60] sm:$0xff] }
  0x6e   : > { %4618 = vmatpush3.bf16.msra.mxu0 %v5478_v16  ;;  %4522 = vmatpush3.bf16.msra.mxu1 %v5478_v16  ;;  %v5569_v45 = vpack.c.bf16 %v6889_v43, %v6890_v42  ;;  %v6885_v57 = vand.u32 4294901760, %v5598_v55  ;;  %v5616_v60 = vld [vmem:[%s5422_s18 + $0x68] sm:$0xff]  ;;  %v5618_v61 = vld [vmem:[#allocation5 + $0x70] sm:$0xff]  ;;  %v5620_v62 = vld [vmem:[#allocation5 + $0x78] sm:$0xff]  ;;  %v595_v4 = vmul.f32 %v5607_v58, %v5607_v58  ;;  %v6993_v16 = vand.u32 4294901760, %v5574_v47  ;;  %s5121_s15 = scalar_lea.vmem %s6818_s23, 128 }
  0x6f   : > { %4620 = vmatprep.subr.bf16.mxu0 %v5500_v23  ;;  %4524 = vmatprep.subr.bf16.mxu1 %v5500_v23  ;;  %6973 = vst [vmem:[#allocation15_spill] sm:$0xff] %v5550_v39  ;;  %v5594_v53 = vpack.c.bf16 %v6887_v50, %v6888_v49  ;;  %v6884_v63 = vand.u32 4294901760, %v5618_v61  ;;  %v6883_v2 = vand.u32 4294901760, %v5620_v62  ;;  %p5122_p6 = scmp.ne.s32.totalorder %s6818_s23, %s5121_s15 }
  0x70   : > { %6974 = vst [vmem:[#allocation16_spill] sm:$0xff] %v5569_v45  ;;  %v5613_v59 = vpack.c.bf16 %v6885_v57, %v6886_v56  ;;  %v477_v57 = vld [vmem:[%s5422_s18 + $0xb0] sm:$0xff]  ;;  %v478_v56 = vld [vmem:[%s5422_s18 + $0xb8] sm:$0xff] }
  0x71   : > { %619 = vadd.xlane.f32.xlu0 %v585_v6  ;;  %621 = vadd.xlane.f32.xlu1 %v586_v7  ;;  %6975 = vst [vmem:[#allocation17_spill] sm:$0xff] %v5594_v53  ;;  %v596_v6 = vmul.f32 %v5616_v60, %v5616_v60  ;;  %v5638_v7 = vpack.c.bf16 %v6883_v2, %v6884_v63  ;;  %p5123_p8 = pnand %p5122_p6, %p5359_p10 }
  0x72   : > { %4622 = vmatpush3.bf16.msra.mxu0 %v5500_v23  ;;  %4526 = vmatpush3.bf16.msra.mxu1 %v5500_v23  ;;  %6976 = vst [vmem:[#allocation18_spill] sm:$0xff] %v5613_v59  ;;  %v605_v50 = vmul.f32 %v477_v57, %v477_v57  ;;  %v606_v49 = vmul.f32 %v478_v56, %v478_v56 }
  0x73   : > { %4624 = vmatprep.subr.bf16.mxu0 %v5525_v31  ;;  %4528 = vmatprep.subr.bf16.mxu1 %v5525_v31  ;;  %6977 = vst [vmem:[#allocation19_spill] sm:$0xff] %v5638_v7  ;;  %p5124_p12 = pneg %p5123_p8 }
  0x75   : > { %495 = vadd.xlane.f32.xlu0 %v5457_v8  ;;  %497 = vadd.xlane.f32.xlu1 %v5460_v9 }
  0x76   : > { %4626 = vmatpush3.bf16.msra.mxu0 %v5525_v31  ;;  %4530 = vmatpush3.bf16.msra.mxu1 %v5525_v31 }
  0x77   : > { %4628 = vmatprep.subr.bf16.mxu0 %v5550_v39  ;;  %4532 = vmatprep.subr.bf16.mxu1 %v5550_v39 }
  0x79   : > { %623 = vadd.xlane.f32.xlu0 %v587_v10  ;;  %625 = vadd.xlane.f32.xlu1 %v588_v11  ;;  %v5645_v10 = vld [vmem:[%s5422_s18 + $0x70] sm:$0xff]  ;;  %v5648_v11 = vld [vmem:[%s5422_s18 + $0x78] sm:$0xff] }
  0x7a   : > { %4630 = vmatpush3.bf16.msra.mxu0 %v5550_v39  ;;  %4534 = vmatpush3.bf16.msra.mxu1 %v5550_v39 }
  0x7b   : > { %4632 = vmatprep.subr.bf16.mxu0 %v5569_v45  ;;  %4536 = vmatprep.subr.bf16.mxu1 %v5569_v45 }
  0x7d   : > { %499 = vadd.xlane.f32.xlu0 %v5485_v19  ;;  %501 = vadd.xlane.f32.xlu1 %v5488_v20 }
  0x7e   : > { %4634 = vmatpush3.bf16.msra.mxu0 %v5569_v45  ;;  %4538 = vmatpush3.bf16.msra.mxu1 %v5569_v45 }
  0x7f   : > { %4636 = vmatprep.subr.bf16.mxu0 %v5594_v53  ;;  %4540 = vmatprep.subr.bf16.mxu1 %v5594_v53 }
  0x81   : > { %627 = vadd.xlane.f32.xlu0 %v589_v24  ;;  %629 = vadd.xlane.f32.xlu1 %v590_v25  ;;  %v597_v24 = vmul.f32 %v5645_v10, %v5645_v10  ;;  %v598_v25 = vmul.f32 %v5648_v11, %v5648_v11 }
  0x82   : > { %4638 = vmatpush3.bf16.msra.mxu0 %v5594_v53  ;;  %4542 = vmatpush3.bf16.msra.mxu1 %v5594_v53 }
  0x83   : > { %4640 = vmatprep.subr.bf16.mxu0 %v5613_v59  ;;  %4544 = vmatprep.subr.bf16.mxu1 %v5613_v59 }
  0x85   : > { %503 = vadd.xlane.f32.xlu0 %v5519_v30  ;;  %505 = vadd.xlane.f32.xlu1 %v5528_v32 }
  0x86   : > { %4642 = vmatpush3.bf16.msra.mxu0 %v5613_v59  ;;  %4546 = vmatpush3.bf16.msra.mxu1 %v5613_v59  ;;  %v6987_v59 = vand.u32 4294901760, %v5532_v34 }
  0x87   : > { %4644 = vmatprep.subr.bf16.mxu0 %v5638_v7  ;;  %4548 = vmatprep.subr.bf16.mxu1 %v5638_v7 }
  0x89   : > { %631 = vadd.xlane.f32.xlu0 %v591_v37  ;;  %633 = vadd.xlane.f32.xlu1 %v592_v38  ;;  %v5657_v37 = vld [vmem:[%s5422_s18 + $0x80] sm:$0xff]  ;;  %v5660_v38 = vld [vmem:[%s5422_s18 + $0x88] sm:$0xff] }
  0x8a   : > { %4646 = vmatpush3.bf16.msra.mxu0 %v5638_v7  ;;  %4550 = vmatpush3.bf16.msra.mxu1 %v5638_v7  ;;  %v5748_v7 = vsub.f32 %v5530_v33, %v1055_v35 }
  0x8c   : > { %6986 = vst [vmem:[#allocation28_spill] sm:$0xff] %v5748_v7  ;;  %v1482_v33 = vand.u32 4294901760, %v5748_v7 }
  0x8d   : > { %507 = vadd.xlane.f32.xlu0 %v5563_v44  ;;  %509 = vadd.xlane.f32.xlu1 %v5572_v46 }
  0x91   : > { %635 = vadd.xlane.f32.xlu0 %v593_v51  ;;  %637 = vadd.xlane.f32.xlu1 %v594_v52  ;;  %v599_v51 = vmul.f32 %v5657_v37, %v5657_v37  ;;  %v600_v52 = vmul.f32 %v5660_v38, %v5660_v38 }
  0x95   : > { %511 = vadd.xlane.f32.xlu0 %v5607_v58  ;;  %513 = vadd.xlane.f32.xlu1 %v5616_v60 }
  0x99   : > { %639 = vadd.xlane.f32.xlu0 %v595_v4  ;;  %641 = vadd.xlane.f32.xlu1 %v596_v6  ;;  %v5669_v4 = vld [vmem:[%s5422_s18 + $0x90] sm:$0xff]  ;;  %v5672_v6 = vld [vmem:[%s5422_s18 + $0x98] sm:$0xff] }
  0x9a   : > { %6978 = vst [vmem:[#allocation20_spill] sm:$0xff] %v5669_v4  ;;  %6979 = vst [vmem:[#allocation21_spill] sm:$0xff] %v5672_v6 }
  0x9d   : > { %515 = vadd.xlane.f32.xlu0 %v5645_v10  ;;  %517 = vadd.xlane.f32.xlu1 %v5648_v11 }
  0xa1   : > { %643 = vadd.xlane.f32.xlu0 %v597_v24  ;;  %645 = vadd.xlane.f32.xlu1 %v598_v25  ;;  %v601_v24 = vmul.f32 %v5669_v4, %v5669_v4  ;;  %v602_v25 = vmul.f32 %v5672_v6, %v5672_v6 }
  0xa5   : > { %519 = vadd.xlane.f32.xlu0 %v5657_v37  ;;  %521 = vadd.xlane.f32.xlu1 %v5660_v38 }
  0xa9   : > { %647 = vadd.xlane.f32.xlu0 %v599_v51  ;;  %649 = vadd.xlane.f32.xlu1 %v600_v52  ;;  %v475_v51 = vld [vmem:[%s5422_s18 + $0xa0] sm:$0xff]  ;;  %v476_v52 = vld [vmem:[%s5422_s18 + $0xa8] sm:$0xff] }
  0xaa   : > { %v603_v2 = vmul.f32 %v475_v51, %v475_v51  ;;  %v604_v63 = vmul.f32 %v476_v52, %v476_v52 }
  0xad   : > { %523 = vadd.xlane.f32.xlu0 %v5669_v4  ;;  %525 = vadd.xlane.f32.xlu1 %v5672_v6 }
  0xb1   : > { %651 = vadd.xlane.f32.xlu0 %v601_v24  ;;  %653 = vadd.xlane.f32.xlu1 %v602_v25  ;;  %v479_v24 = vld [vmem:[%s5422_s18 + $0xc0] sm:$0xff]  ;;  %v480_v25 = vld [vmem:[%s5422_s18 + $0xc8] sm:$0xff] }
  0xb5   : > { %527 = vadd.xlane.f32.xlu0 %v475_v51  ;;  %529 = vadd.xlane.f32.xlu1 %v476_v52  ;;  %v607_v51 = vmul.f32 %v479_v24, %v479_v24  ;;  %v608_v52 = vmul.f32 %v480_v25, %v480_v25 }
  0xb9   : > { %655 = vadd.xlane.f32.xlu0 %v603_v2  ;;  %657 = vadd.xlane.f32.xlu1 %v604_v63  ;;  %v481_v63 = vld [vmem:[%s5422_s18 + $0xd0] sm:$0xff]  ;;  %v482_v2 = vld [vmem:[%s5422_s18 + $0xd8] sm:$0xff] }
  0xbd   : > { %531 = vadd.xlane.f32.xlu0 %v477_v57  ;;  %533 = vadd.xlane.f32.xlu1 %v478_v56  ;;  %v609_v57 = vmul.f32 %v481_v63, %v481_v63  ;;  %v610_v56 = vmul.f32 %v482_v2, %v482_v2 }
  0xc1   : > { %659 = vadd.xlane.f32.xlu0 %v605_v50  ;;  %661 = vadd.xlane.f32.xlu1 %v606_v49  ;;  %v483_v49 = vld [vmem:[%s5422_s18 + $0xe0] sm:$0xff]  ;;  %v484_v50 = vld [vmem:[%s5422_s18 + $0xe8] sm:$0xff] }
  0xc2   : > { %v611_v43 = vmul.f32 %v483_v49, %v483_v49  ;;  %v612_v42 = vmul.f32 %v484_v50, %v484_v50 }
  0xc5   : > { %535 = vadd.xlane.f32.xlu0 %v479_v24  ;;  %537 = vadd.xlane.f32.xlu1 %v480_v25  ;;  %v485_v24 = vld [vmem:[%s5422_s18 + $0xf0] sm:$0xff]  ;;  %v486_v25 = vld [vmem:[%s5422_s18 + $0xf8] sm:$0xff] }
  0xc9   : > { %663 = vadd.xlane.f32.xlu0 %v607_v51  ;;  %665 = vadd.xlane.f32.xlu1 %v608_v52  ;;  %v5695_v51 = vsub.f32 %v5468_v12, %v1037_v14  ;;  %v5700_v52 = vsub.f32 %v5470_v13, %v1040_v15  ;;  %v5715_v15 = vsub.f32 %v5480_v17, %v1043_v21 }
  0xcb   : > { %6980 = vst [vmem:[#allocation22_spill] sm:$0xff] %v5695_v51  ;;  %6981 = vst [vmem:[#allocation23_spill] sm:$0xff] %v5700_v52 }
  0xcc   : > { %6982 = vst [vmem:[#allocation24_spill] sm:$0xff] %v5715_v15 }
  0xcd   : > { %539 = vadd.xlane.f32.xlu0 %v481_v63  ;;  %541 = vadd.xlane.f32.xlu1 %v482_v2  ;;  %v613_v63 = vmul.f32 %v485_v24, %v485_v24  ;;  %v614_v2 = vmul.f32 %v486_v25, %v486_v25 }
  0xd1   : > { %667 = vadd.xlane.f32.xlu0 %v609_v57  ;;  %669 = vadd.xlane.f32.xlu1 %v610_v56  ;;  %v1440_v57 = vand.u32 4294901760, %v5695_v51 }
  0xd5   : > { %543 = vadd.xlane.f32.xlu0 %v483_v49  ;;  %545 = vadd.xlane.f32.xlu1 %v484_v50  ;;  %v5720_v50 = vsub.f32 %v5482_v18, %v1046_v22 }
  0xd7   : > { %6983 = vst [vmem:[#allocation25_spill] sm:$0xff] %v5720_v50 }
  0xd9   : > { %671 = vadd.xlane.f32.xlu0 %v611_v43  ;;  %673 = vadd.xlane.f32.xlu1 %v612_v42  ;;  %v1447_v42 = vand.u32 4294901760, %v5700_v52  ;;  %v1441_v43 = vsub.f32 %v5695_v51, %v1440_v57 }
  0xdb   : > { %v1448_v56 = vsub.f32 %v5700_v52, %v1447_v42  ;;  %v5706_v49 = vpack.c.bf16 %v1447_v42, %v1440_v57  ;;  %v1442_v12 = vand.u32 4294901760, %v1441_v43  ;;  %v5798_v52 = vsub.f32 %v5574_v47, %v6993_v16 }
  0xdd   : > { %547 = vadd.xlane.f32.xlu0 %v485_v24  ;;  %549 = vadd.xlane.f32.xlu1 %v486_v25  ;;  %v1449_v14 = vand.u32 4294901760, %v1448_v56  ;;  %v1454_v24 = vand.u32 4294901760, %v5715_v15  ;;  %v1461_v25 = vand.u32 4294901760, %v5720_v50  ;;  %6994 = vst [vmem:[#allocation32_spill] sm:$0xff] %v5798_v52 }
  0xde   : > { %4648 = vmatprep.subr.bf16.mxu0 %v5706_v49 }
  0xdf   : > { %v5709_v13 = vpack.c.bf16 %v1449_v14, %v1442_v12  ;;  %v1455_v57 = vsub.f32 %v5715_v15, %v1454_v24  ;;  %v1462_v18 = vsub.f32 %v5720_v50, %v1461_v25  ;;  %v5758_v45 = vpack.c.bf16 %v1461_v25, %v1454_v24 }
  0xe0   : > { %v6989_v24 = vand.u32 4294901760, %v5552_v40 }
  0xe1   : > { %675 = vadd.xlane.f32.xlu0 %v613_v63  ;;  %677 = vadd.xlane.f32.xlu1 %v614_v2  ;;  %v5727_v63 = vsub.f32 %v5510_v26, %v1049_v28  ;;  %v5732_v2 = vsub.f32 %v5512_v27, %v1052_v29  ;;  %v1456_v28 = vand.u32 4294901760, %v1455_v57  ;;  %v1463_v12 = vand.u32 4294901760, %v1462_v18 }
  0xe2   : > { %4552 = vmatprep.subr.bf16.mxu1 %v5709_v13  ;;  %v5754_v57 = vsub.f32 %v5532_v34, %v6987_v59  ;;  %v5773_v25 = vsub.f32 %v5552_v40, %v6989_v24  ;;  %v1483_v40 = vsub.f32 %v5748_v7, %v1482_v33 }
  0xe3   : > { %6984 = vst [vmem:[#allocation26_spill] sm:$0xff] %v5727_v63  ;;  %6985 = vst [vmem:[#allocation27_spill] sm:$0xff] %v5732_v2  ;;  %v1468_v22 = vand.u32 4294901760, %v5727_v63  ;;  %v1475_v43 = vand.u32 4294901760, %v5732_v2 }
  0xe4   : > { %6988 = vst [vmem:[#allocation29_spill] sm:$0xff] %v5754_v57  ;;  %6990 = vst [vmem:[#allocation30_spill] sm:$0xff] %v5773_v25 }
  0xe5   : > { %v1469_v14 = vsub.f32 %v5727_v63, %v1468_v22  ;;  %v5762_v63 = vpack.c.bf16 %v1475_v43, %v1468_v22  ;;  %v6991_v22 = vand.u32 4294901760, %v5554_v41 }
  0xe7   : > { %v1470_v31 = vand.u32 4294901760, %v1469_v14 }
  0xf2   : > { %v494_v17 = vpop.xlane.xlu1 %493  ;;  %v488_v21 = vpop.xlane.xlu0 %487 }
  0xf3   : > { %v5737_v42 = vmul.f32 0.0078125, %v488_v21  ;;  %v1476_v21 = vsub.f32 %v5732_v2, %v1475_v43  ;;  %v5756_v18 = vmul.f32 0.0078125, %v494_v17  ;;  %v5778_v43 = vsub.f32 %v5554_v41, %v6991_v22 }
  0xf5   : > { %v711_v27 = vmul.f32 %v5737_v42, %v5737_v42  ;;  %v1477_v17 = vand.u32 4294901760, %v1476_v21  ;;  %6992 = vst [vmem:[#allocation31_spill] sm:$0xff] %v5778_v43  ;;  %v1503_v41 = vand.u32 4294901760, %v5778_v43 }
  0xf6   : > { %v490_v56 = vpop.xlane.xlu0 %489  ;;  %v616_v26 = vpop.xlane.xlu1 %615 }
  0xf7   : > { %v5743_v29 = vmul.f32 0.0078125, %v490_v56  ;;  %v679_v36 = vmul.f32 0.0078125, %v616_v26  ;;  %v5760_v26 = vpack.c.bf16 %v1463_v12, %v1456_v28  ;;  %v714_v28 = vmul.f32 %v5756_v18, %v5756_v18 }
  0xf9   : > { %v743_v53 = vsub.f32 %v679_v36, %v711_v27  ;;  %v712_v35 = vmul.f32 %v5743_v29, %v5743_v29  ;;  %v1489_v36 = vand.u32 4294901760, %v5754_v57 }
  0xfa   : > { %v492_v56 = vpop.xlane.xlu0 %491  ;;  %v618_v39 = vpop.xlane.xlu1 %617 }
  0xfb   : > { %v775_v2 = vmax.f32 %v743_v53, 0.0  ;;  %v5767_v34 = vmul.f32 0.0078125, %v492_v56  ;;  %v680_v59 = vmul.f32 0.0078125, %v618_v39  ;;  %v1496_v56 = vand.u32 4294901760, %v5773_v25 }
  0xfc   : > { %v871_v53 = vsub.f32 %v5436_v1, %v5737_v42  ;;  %v1484_v1 = vand.u32 4294901760, %v1483_v40  ;;  %v6995_v42 = vand.u32 4294901760, %v5576_v48 }
  0xfd   : > { %v807_v39 = vadd.f32 1e-05, %v775_v2  ;;  %v744_v12 = vsub.f32 %v680_v59, %v712_v35  ;;  %v713_v14 = vmul.f32 %v5767_v34, %v5767_v34  ;;  %v5791_v2 = vpack.c.bf16 %v1477_v17, %v1470_v31 }
  0xfe   : > { %v620_v27 = vpop.xlane.xlu0 %619  ;;  %v622_v21 = vpop.xlane.xlu1 %621  ;;  %v1490_v35 = vsub.f32 %v5754_v57, %v1489_v36  ;;  %v1497_v59 = vsub.f32 %v5773_v25, %v1496_v56  ;;  %v1504_v31 = vsub.f32 %v5778_v43, %v1503_v41  ;;  %v5806_v17 = vsub.f32 %v5576_v48, %v6995_v42 }
  0xff   : > { %4979 = vrsqrt.f32 %v807_v39  ;;  %v776_v24 = vmax.f32 %v744_v12, 0.0  ;;  %v681_v22 = vmul.f32 0.0078125, %v620_v27  ;;  %v682_v23 = vmul.f32 0.0078125, %v622_v21 }
 0x100   : > { %6996 = vst [vmem:[#allocation33_spill] sm:$0xff] %v5806_v17  ;;  %v1491_v47 = vand.u32 4294901760, %v1490_v35  ;;  %v1510_v21 = vand.u32 4294901760, %v5798_v52  ;;  %v5814_v39 = vpack.c.bf16 %v1489_v36, %v1482_v33  ;;  %v1498_v43 = vand.u32 4294901760, %v1497_v59 }
 0x101   : > { %v808_v50 = vadd.f32 1e-05, %v776_v24  ;;  %v745_v15 = vsub.f32 %v681_v22, %v713_v14  ;;  %v746_v7 = vsub.f32 %v682_v23, %v714_v28  ;;  %v1517_v24 = vand.u32 4294901760, %v5806_v17 }
 0x102   : > { %v496_v12 = vpop.xlane.xlu0 %495  ;;  %v498_v27 = vpop.xlane.xlu1 %497  ;;  %v873_v33 = vsub.f32 %v5449_v5, %v5767_v34  ;;  %v5824_v36 = vpack.c.bf16 %v1491_v47, %v1484_v1  ;;  %v6997_v59 = vand.u32 4294901760, %v5596_v54  ;;  %v5838_v47 = vpack.c.bf16 %v1503_v41, %v1496_v56 }
 0x103   : > { %4981 = vrsqrt.f32 %v808_v50  ;;  %v777_v23 = vmax.f32 %v745_v15, 0.0  ;;  %v778_v28 = vmax.f32 %v746_v7, 0.0  ;;  %v5808_v14 = vmul.f32 0.0078125, %v496_v12 }
 0x104   : > { %v5810_v16 = vmul.f32 0.0078125, %v498_v27  ;;  %v1505_v7 = vand.u32 4294901760, %v1504_v31  ;;  %v1511_v12 = vsub.f32 %v5798_v52, %v1510_v21  ;;  %v1518_v27 = vsub.f32 %v5806_v17, %v1517_v24 }
 0x105   : > { %v809_v40 = vadd.f32 1e-05, %v777_v23  ;;  %v810_v22 = vadd.f32 1e-05, %v778_v28  ;;  %v715_v35 = vmul.f32 %v5808_v14, %v5808_v14  ;;  %v5829_v31 = vsub.f32 %v5596_v54, %v6997_v59 }
 0x106   : > { %v716_v48 = vmul.f32 %v5810_v16, %v5810_v16  ;;  %v624_v50 = vpop.xlane.xlu0 %623  ;;  %v626_v15 = vpop.xlane.xlu1 %625  ;;  %v5836_v1 = vpack.c.bf16 %v1505_v7, %v1498_v43 }
 0x107   : > { %4983 = vrsqrt.f32 %v809_v40  ;;  %v683_v42 = vmul.f32 0.0078125, %v624_v50  ;;  %v684_v23 = vmul.f32 0.0078125, %v626_v15  ;;  %v5834_v40 = vld [vmem:[%s6870_s3] ss:$0 sm:$0xff]  ;;  %v1512_v50 = vand.u32 4294901760, %v1511_v12 }
 0x108   : > { %4985 = vrsqrt.f32 %v810_v22  ;;  %v1519_v15 = vand.u32 4294901760, %v1518_v27  ;;  %v6918_v54 = vand.u32 4294901760, %v5829_v31  ;;  %v5848_v12 = vld [vmem:[%s6871_s4] ss:$0 sm:$0xff]  ;;  %v5862_v27 = vpack.c.bf16 %v1517_v24, %v1510_v21 }
 0x109   : > { %v4980_v28 = vpop.eup %4979  ;;  %v747_v52 = vsub.f32 %v683_v42, %v715_v35  ;;  %v748_v17 = vsub.f32 %v684_v23, %v716_v48 }
 0x10a   : > { %v500_v25 = vpop.xlane.xlu0 %499  ;;  %v502_v5 = vpop.xlane.xlu1 %501  ;;  %v903_v34 = vmul.f32 %v4980_v28, %v871_v53  ;;  %v5860_v7 = vpack.c.bf16 %v1519_v15, %v1512_v50  ;;  %v5867_v42 = vsub.f32 %v5829_v31, %v6918_v54  ;;  %v7002_v53 = vand.u32 4294901760, %v5618_v61 }
 0x10b   : > { %v779_v22 = vmax.f32 %v747_v52, 0.0  ;;  %v780_v59 = vmax.f32 %v748_v17, 0.0  ;;  %v5841_v35 = vmul.f32 0.0078125, %v500_v25  ;;  %v5843_v48 = vmul.f32 0.0078125, %v502_v5 }
 0x10c   : > { %v942_v56 = vmul.f32 %v5834_v40, %v903_v34  ;;  %v6998_v52 = vand.u32 4294901760, %v5598_v55 }
 0x10d   : > { %v4982_v41 = vpop.eup %4981  ;;  %v811_v17 = vadd.f32 1e-05, %v779_v22  ;;  %v812_v23 = vadd.f32 1e-05, %v780_v59  ;;  %v718_v28 = vmul.f32 %v5843_v48, %v5843_v48  ;;  %v7000_v22 = vsub.f32 %v5443_v3, %v5743_v29 }
 0x10e   : > { %v5858_v25 = vsub.f32 %v5598_v55, %v6998_v52  ;;  %v628_v5 = vpop.xlane.xlu0 %627  ;;  %v630_v34 = vpop.xlane.xlu1 %629  ;;  %v981_v55 = vadd.f32 %v5848_v12, %v942_v56  ;;  %v717_v21 = vmul.f32 %v5841_v35, %v5841_v35  ;;  %v5884_v56 = vsub.f32 %v5618_v61, %v7002_v53 }
 0x10f   : > { %v904_v50 = vmul.f32 %v4982_v41, %v7000_v22  ;;  %4987 = vrsqrt.f32 %v811_v17  ;;  %v685_v24 = vmul.f32 0.0078125, %v628_v5  ;;  %v686_v15 = vmul.f32 0.0078125, %v630_v34 }
 0x110   : > { %6999 = vst [vmem:[#allocation34_spill] sm:$0xff] %v5858_v25  ;;  %v5877_v52 = vand.u32 4294901760, %v981_v55  ;;  %v1531_v43 = vand.u32 4294901760, %v5858_v25  ;;  %4989 = vrsqrt.f32 %v812_v23 }
 0x111   : > { %v943_v59 = vmul.f32 %v5834_v40, %v904_v50  ;;  %v4984_v54 = vpop.eup %4983  ;;  %v749_v41 = vsub.f32 %v685_v24, %v717_v21  ;;  %v750_v17 = vsub.f32 %v686_v15, %v718_v28  ;;  %v7004_v28 = vsub.f32 %v5433_v0, %v5756_v18 }
 0x112   : > { %7001 = vst [vmem:[#allocation35_spill] sm:$0xff] %v5877_v52  ;;  %v4986_v5 = vpop.eup %4985  ;;  %v504_v34 = vpop.xlane.xlu0 %503  ;;  %v5891_v50 = vsub.f32 %v981_v55, %v5877_v52  ;;  %v905_v61 = vmul.f32 %v4984_v54, %v873_v33  ;;  %v5907_v54 = vsub.f32 %v5858_v25, %v1531_v43  ;;  %v7006_v33 = vand.u32 4294901760, %v5829_v31 }
 0x113   : > { %v506_v22 = vpop.xlane.xlu1 %505  ;;  %v982_v57 = vadd.f32 %v5848_v12, %v943_v59  ;;  %v781_v53 = vmax.f32 %v749_v41, 0.0  ;;  %v782_v51 = vmax.f32 %v750_v17, 0.0  ;;  %v5894_v6 = vmul.f32 0.0078125, %v504_v34 }
 0x114   : > { %7003 = vst [vmem:[#allocation36_spill] sm:$0xff] %v5891_v50  ;;  %v5896_v3 = vmul.f32 0.0078125, %v506_v22  ;;  %v1119_v29 = vand.u32 4294901760, %v5891_v50  ;;  %v944_v23 = vmul.f32 %v5834_v40, %v905_v61  ;;  %v906_v55 = vmul.f32 %v4986_v5, %v7004_v28 }
 0x115   : > { %v5899_v21 = vand.u32 4294901760, %v982_v57  ;;  %v813_v24 = vadd.f32 1e-05, %v781_v53  ;;  %v814_v15 = vadd.f32 1e-05, %v782_v51  ;;  %v719_v59 = vmul.f32 %v5894_v6, %v5894_v6 }
 0x116   : > { %v720_v41 = vmul.f32 %v5896_v3, %v5896_v3  ;;  %v632_v17 = vpop.xlane.xlu0 %631  ;;  %4311 = vmatprep.mubr.f32.mxu0 %v1119_v29  ;;  %v1120_v22 = vsub.f32 %v5891_v50, %v1119_v29  ;;  %v983_v5 = vadd.f32 %v5848_v12, %v944_v23  ;;  %v945_v28 = vmul.f32 %v5834_v40, %v906_v55 }
 0x117   : > { %v634_v34 = vpop.xlane.xlu1 %633  ;;  %v5915_v0 = vsub.f32 %v982_v57, %v5899_v21  ;;  %4991 = vrsqrt.f32 %v813_v24  ;;  %v687_v51 = vmul.f32 0.0078125, %v632_v17  ;;  %v5922_v25 = vpack.c.bf16 %v1531_v43, %v7006_v33 }
 0x118   : > { %v688_v18 = vmul.f32 0.0078125, %v634_v34  ;;  %v1121_v61 = vand.u32 4294901760, %v1120_v22  ;;  %v5924_v50 = vand.u32 4294901760, %v983_v5  ;;  %v6929_v57 = vand.u32 4294901760, %v5884_v56 }
 0x119   : > { %7005 = vst [vmem:[#allocation37_spill] sm:$0xff] %v5915_v0  ;;  %v1129_v53 = vand.u32 4294901760, %v5915_v0  ;;  %v4988_v52 = vpop.eup %4987  ;;  %v751_v4 = vsub.f32 %v687_v51, %v719_v59  ;;  %4993 = vrsqrt.f32 %v814_v15  ;;  %v984_v55 = vadd.f32 %v5848_v12, %v945_v28 }
 0x11a   : > { %v752_v29 = vsub.f32 %v688_v18, %v720_v41  ;;  %v508_v24 = vpop.xlane.xlu0 %507  ;;  %4071 = vmatprep.mubr.f32.mxu1 %v1121_v61  ;;  %v7007_v43 = vsub.f32 %v5457_v8, %v5808_v14  ;;  %v4990_v15 = vpop.eup %4989  ;;  %v5938_v18 = vsub.f32 %v983_v5, %v5924_v50 }
 0x11b   : > { %4312 = vmatmul.mubr.f32.vlgmr.msra.gmra.mrb[0].mxu0 %v1129_v53  ;;  %v510_v23 = vpop.xlane.xlu1 %509  ;;  %v1130_v17 = vsub.f32 %v5915_v0, %v1129_v53  ;;  %v783_v34 = vmax.f32 %v751_v4, 0.0  ;;  %v5932_v41 = vmul.f32 0.0078125, %v508_v24  ;;  %v5940_v61 = vand.u32 4294901760, %v984_v55 }
 0x11c   : > { %v907_v33 = vmul.f32 %v4988_v52, %v7007_v43  ;;  %v784_v59 = vmax.f32 %v752_v29, 0.0  ;;  %v5934_v22 = vmul.f32 0.0078125, %v510_v23  ;;  %4650 = vmatpush3.bf16.msra.mxu0 %v5706_v49  ;;  %7008 = vst [vmem:[#allocation38_spill] sm:$0xff] %v5938_v18  ;;  %v1533_v52 = vand.u32 4294901760, %v5907_v54 }
 0x11d   : > { %v1131_v51 = vand.u32 4294901760, %v1130_v17  ;;  %4652 = vmatprep.subr.bf16.mxu0 %v5758_v45  ;;  %v815_v4 = vadd.f32 1e-05, %v783_v34  ;;  %v721_v49 = vmul.f32 %v5932_v41, %v5932_v41  ;;  %v1139_v29 = vand.u32 4294901760, %v5938_v18 }
 0x11e   : > { %v946_v53 = vmul.f32 %v5834_v40, %v907_v33  ;;  %v816_v14 = vadd.f32 1e-05, %v784_v59  ;;  %v722_v5 = vmul.f32 %v5934_v22, %v5934_v22  ;;  %v636_v28 = vpop.xlane.xlu0 %635  ;;  %v5953_v23 = vsub.f32 %v984_v55, %v5940_v61 }
 0x11f   : > { %4072 = vmatmul.mubr.f32.vlgmr.msra.gmra.mrb[0].mxu1 %v1131_v51  ;;  %v638_v24 = vpop.xlane.xlu1 %637  ;;  %4995 = vrsqrt.f32 %v815_v4  ;;  %v689_v17 = vmul.f32 0.0078125, %v636_v28  ;;  %4314 = vmatprep.mubr.f32.mxu0 %v1139_v29  ;;  %v1140_v59 = vsub.f32 %v5938_v18, %v1139_v29  ;;  %v7010_v55 = vsub.f32 %v5460_v9, %v5810_v16 }
 0x120   : > { %7009 = vst [vmem:[#allocation39_spill] sm:$0xff] %v5953_v23  ;;  %v690_v43 = vmul.f32 0.0078125, %v638_v24  ;;  %v985_v33 = vadd.f32 %v5848_v12, %v946_v53  ;;  %4554 = vmatpush3.bf16.msra.mxu1 %v5709_v13  ;;  %4654 = vmatpush3.bf16.msra.mxu0 %v5758_v45  ;;  %v1149_v34 = vand.u32 4294901760, %v5953_v23  ;;  %4997 = vrsqrt.f32 %v816_v14 }
 0x121   : > { %v908_v51 = vmul.f32 %v4990_v15, %v7010_v55  ;;  %4556 = vmatprep.subr.bf16.mxu1 %v5760_v26  ;;  %v4992_v4 = vpop.eup %4991  ;;  %v753_v53 = vsub.f32 %v689_v17, %v721_v49  ;;  %4656 = vmatprep.subr.bf16.mxu0 %v5762_v63  ;;  %v1141_v24 = vand.u32 4294901760, %v1140_v59  ;;  %v7011_v9 = vsub.f32 %v5485_v19, %v5841_v35 }
 0x122   : > { %v754_v13 = vsub.f32 %v690_v43, %v722_v5  ;;  %v5966_v28 = vand.u32 4294901760, %v985_v33  ;;  %4315 = vmatmul.mubr.f32.gmra.mrb[2].mxu0 %v1149_v34  ;;  %v512_v45 = vpop.xlane.xlu0 %511  ;;  %v1150_v29 = vsub.f32 %v5953_v23, %v1149_v34  ;;  %v881_v35 = vsub.f32 %v5563_v44, %v5932_v41 }
 0x123   : > { %v514_v54 = vpop.xlane.xlu1 %513  ;;  %v947_v8 = vmul.f32 %v5834_v40, %v908_v51  ;;  %v909_v16 = vmul.f32 %v4992_v4, %v7011_v9  ;;  %v785_v15 = vmax.f32 %v753_v53, 0.0  ;;  %v5974_v49 = vmul.f32 0.0078125, %v512_v45  ;;  %v4994_v17 = vpop.eup %4993  ;;  %4074 = vmatprep.mubr.f32.mxu1 %v1141_v24 }
 0x124   : > { %v786_v14 = vmax.f32 %v754_v13, 0.0  ;;  %v5976_v5 = vmul.f32 0.0078125, %v514_v54  ;;  %4558 = vmatpush3.bf16.msra.mxu1 %v5760_v26  ;;  %4658 = vmatpush3.bf16.msra.mxu0 %v5762_v63  ;;  %v1151_v43 = vand.u32 4294901760, %v1150_v29  ;;  %v5981_v34 = vsub.f32 %v985_v33, %v5966_v28 }
 0x125   : > { %v986_v59 = vadd.f32 %v5848_v12, %v947_v8  ;;  %v948_v19 = vmul.f32 %v5834_v40, %v909_v16  ;;  %4560 = vmatprep.subr.bf16.mxu1 %v5791_v2  ;;  %v882_v26 = vsub.f32 %v5572_v46, %v5934_v22  ;;  %v817_v54 = vadd.f32 1e-05, %v785_v15  ;;  %4660 = vmatprep.subr.bf16.mxu0 %v5814_v39 }
 0x126   : > { %7012 = vst [vmem:[#allocation40_spill] sm:$0xff] %v5981_v34  ;;  %v7013_v63 = vand.u32 4294901760, %v5867_v42  ;;  %v723_v8 = vmul.f32 %v5974_v49, %v5974_v49  ;;  %v724_v33 = vmul.f32 %v5976_v5, %v5976_v5  ;;  %4075 = vmatmul.mubr.f32.gmra.mrb[2].mxu1 %v1151_v43  ;;  %v640_v51 = vpop.xlane.xlu0 %639  ;;  %v1159_v4 = vand.u32 4294901760, %v5981_v34 }
 0x127   : > { %v642_v53 = vpop.xlane.xlu1 %641  ;;  %v6000_v13 = vand.u32 4294901760, %v986_v59  ;;  %4999 = vrsqrt.f32 %v817_v54  ;;  %v691_v45 = vmul.f32 0.0078125, %v640_v51  ;;  %v987_v42 = vadd.f32 %v5848_v12, %v948_v19 }
 0x128   : > { %v5993_v55 = vpack.c.bf16 %v1533_v52, %v7013_v63  ;;  %v692_v24 = vmul.f32 0.0078125, %v642_v53  ;;  %4562 = vmatpush3.bf16.msra.mxu1 %v5791_v2  ;;  %4662 = vmatpush3.bf16.msra.mxu0 %v5814_v39  ;;  %v818_v52 = vadd.f32 1e-05, %v786_v14  ;;  %v1160_v9 = vsub.f32 %v5981_v34, %v1159_v4 }
 0x129   : > { %4317 = vmatprep.mubr.f32.mxu0 %v1159_v4  ;;  %v6006_v29 = vsub.f32 %v986_v59, %v6000_v13  ;;  %v7015_v16 = vsub.f32 %v5488_v20, %v5843_v48  ;;  %4564 = vmatprep.subr.bf16.mxu1 %v5824_v36  ;;  %v4996_v43 = vpop.eup %4995  ;;  %v755_v54 = vsub.f32 %v691_v45, %v723_v8  ;;  %v6013_v63 = vand.u32 4294901760, %v987_v42 }
 0x12a   : > { %v756_v19 = vsub.f32 %v692_v24, %v724_v33  ;;  %4664 = vmatprep.subr.bf16.mxu0 %v5838_v47  ;;  %v6019_v2 = vsub.f32 %v5884_v56, %v6929_v57  ;;  %v516_v14 = vpop.xlane.xlu0 %515  ;;  %v1161_v59 = vand.u32 4294901760, %v1160_v9  ;;  %v4998_v33 = vpop.eup %4997  ;;  %5001 = vrsqrt.f32 %v818_v52 }
 0x12b   : > { %7014 = vst [vmem:[#allocation41_spill] sm:$0xff] %v6006_v29  ;;  %v910_v15 = vmul.f32 %v4994_v17, %v7015_v16  ;;  %v1169_v39 = vand.u32 4294901760, %v6006_v29  ;;  %v518_v20 = vpop.xlane.xlu1 %517  ;;  %v7016_v17 = vsub.f32 %v5519_v30, %v5894_v6  ;;  %v787_v51 = vmax.f32 %v755_v54, 0.0 }
 0x12c   : > { %v788_v4 = vmax.f32 %v756_v19, 0.0  ;;  %v6026_v53 = vmul.f32 0.0078125, %v516_v14  ;;  %v6028_v45 = vmul.f32 0.0078125, %v518_v20  ;;  %4566 = vmatpush3.bf16.msra.mxu1 %v5824_v36  ;;  %4666 = vmatpush3.bf16.msra.mxu0 %v5838_v47  ;;  %v6034_v9 = vsub.f32 %v987_v42, %v6013_v63 }
 0x12d   : > { %v949_v48 = vmul.f32 %v5834_v40, %v910_v15  ;;  %v911_v8 = vmul.f32 %v4996_v43, %v7016_v17  ;;  %4318 = vmatmul.mubr.f32.gmra.mrb[4].mxu0 %v1169_v39  ;;  %4077 = vmatprep.mubr.f32.mxu1 %v1161_v59  ;;  %v1170_v24 = vsub.f32 %v6006_v29, %v1169_v39  ;;  %v819_v15 = vadd.f32 1e-05, %v787_v51 }
 0x12e   : > { %7017 = vst [vmem:[#allocation42_spill] sm:$0xff] %v6034_v9  ;;  %v883_v6 = vsub.f32 %v5607_v58, %v5974_v49  ;;  %v884_v16 = vsub.f32 %v5616_v60, %v5976_v5  ;;  %v820_v36 = vadd.f32 1e-05, %v788_v4  ;;  %4568 = vmatprep.subr.bf16.mxu1 %v5836_v1  ;;  %4668 = vmatprep.subr.bf16.mxu0 %v5862_v27  ;;  %v644_v43 = vpop.xlane.xlu0 %643  ;;  %v1179_v54 = vand.u32 4294901760, %v6034_v9 }
 0x12f   : > { %v988_v30 = vadd.f32 %v5848_v12, %v949_v48  ;;  %v725_v47 = vmul.f32 %v6026_v53, %v6026_v53  ;;  %v726_v42 = vmul.f32 %v6028_v45, %v6028_v45  ;;  %v1171_v52 = vand.u32 4294901760, %v1170_v24  ;;  %v646_v19 = vpop.xlane.xlu1 %645 }
 0x130   : > { %5003 = vrsqrt.f32 %v819_v15  ;;  %v693_v39 = vmul.f32 0.0078125, %v644_v43  ;;  %v694_v14 = vmul.f32 0.0078125, %v646_v19  ;;  %4570 = vmatpush3.bf16.msra.mxu1 %v5836_v1  ;;  %4670 = vmatpush3.bf16.msra.mxu0 %v5862_v27  ;;  %v1180_v20 = vsub.f32 %v6034_v9, %v1179_v54 }
 0x131   : > { %v6048_v59 = vand.u32 4294901760, %v988_v30  ;;  %4078 = vmatmul.mubr.f32.gmra.mrb[4].mxu1 %v1171_v52  ;;  %4320 = vmatprep.mubr.f32.mxu0 %v1179_v54  ;;  %v950_v48 = vmul.f32 %v5834_v40, %v911_v8  ;;  %v7018_v17 = vsub.f32 %v5528_v32, %v5896_v3  ;;  %v5000_v24 = vpop.eup %4999  ;;  %5005 = vrsqrt.f32 %v820_v36 }
 0x132   : > { %v757_v15 = vsub.f32 %v693_v39, %v725_v47  ;;  %v758_v43 = vsub.f32 %v694_v14, %v726_v42  ;;  %4572 = vmatprep.subr.bf16.mxu1 %v5860_v7  ;;  %4672 = vmatprep.subr.bf16.mxu0 %v5922_v25  ;;  %v520_v27 = vpop.xlane.xlu0 %519  ;;  %v1181_v52 = vand.u32 4294901760, %v1180_v20  ;;  %v913_v3 = vmul.f32 %v5000_v24, %v881_v35 }
 0x133   : > { %v912_v51 = vmul.f32 %v4998_v33, %v7018_v17  ;;  %v6059_v1 = vsub.f32 %v988_v30, %v6048_v59  ;;  %v522_v8 = vpop.xlane.xlu1 %521  ;;  %v989_v54 = vadd.f32 %v5848_v12, %v950_v48  ;;  %v6069_v47 = vmul.f32 0.0078125, %v520_v27 }
 0x134   : > { %v789_v33 = vmax.f32 %v757_v15, 0.0  ;;  %v790_v36 = vmax.f32 %v758_v43, 0.0  ;;  %4574 = vmatpush3.bf16.msra.mxu1 %v5860_v7  ;;  %4674 = vmatpush3.bf16.msra.mxu0 %v5922_v25  ;;  %v6073_v42 = vmul.f32 0.0078125, %v522_v8  ;;  %v952_v44 = vmul.f32 %v5834_v40, %v913_v3  ;;  %v5002_v25 = vpop.eup %5001 }
 0x135   : > { %7019 = vst [vmem:[#allocation43_spill] sm:$0xff] %v6059_v1  ;;  %v951_v32 = vmul.f32 %v5834_v40, %v912_v51  ;;  %v1189_v30 = vand.u32 4294901760, %v6059_v1  ;;  %4080 = vmatprep.mubr.f32.mxu1 %v1181_v52  ;;  %v6075_v19 = vand.u32 4294901760, %v989_v54  ;;  %4576 = vmatprep.subr.bf16.mxu1 %v5993_v55  ;;  %v885_v41 = vsub.f32 %v5645_v10, %v6026_v53  ;;  %v7026_v10 = vld [vmem:[#allocation21_spill] sm:$0xff] }
 0x136   : > { %v886_v35 = vsub.f32 %v5648_v11, %v6028_v45  ;;  %v821_v7 = vadd.f32 1e-05, %v789_v33  ;;  %v822_v14 = vadd.f32 1e-05, %v790_v36  ;;  %v727_v20 = vmul.f32 %v6069_v47, %v6069_v47  ;;  %v648_v51 = vpop.xlane.xlu0 %647 }
 0x137   : > { %v990_v39 = vadd.f32 %v5848_v12, %v951_v32  ;;  %4321 = vmatmul.mubr.f32.gmra.mrb[6].mxu0 %v1189_v30  ;;  %v728_v48 = vmul.f32 %v6073_v42, %v6073_v42  ;;  %v1190_v17 = vsub.f32 %v6059_v1, %v1189_v30  ;;  %v6090_v24 = vsub.f32 %v989_v54, %v6075_v19  ;;  %v650_v15 = vpop.xlane.xlu1 %649 }
 0x138   : > { %5007 = vrsqrt.f32 %v821_v7  ;;  %v695_v43 = vmul.f32 0.0078125, %v648_v51  ;;  %v696_v27 = vmul.f32 0.0078125, %v650_v15  ;;  %4578 = vmatpush3.bf16.msra.mxu1 %v5993_v55  ;;  %v991_v33 = vadd.f32 %v5848_v12, %v952_v44 }
 0x139   : > { %7020 = vst [vmem:[#allocation44_spill] sm:$0xff] %v6090_v24  ;;  %v6092_v52 = vand.u32 4294901760, %v990_v39  ;;  %v1191_v32 = vand.u32 4294901760, %v1190_v17  ;;  %v1199_v3 = vand.u32 4294901760, %v6090_v24  ;;  %v914_v7 = vmul.f32 %v5002_v25, %v882_v26 }
 0x13a   : > { %v5004_v36 = vpop.eup %5003  ;;  %v759_v30 = vsub.f32 %v695_v43, %v727_v20  ;;  %v760_v54 = vsub.f32 %v696_v27, %v728_v48  ;;  %5009 = vrsqrt.f32 %v822_v14  ;;  %v524_v55 = vpop.xlane.xlu0 %523  ;;  %v6106_v15 = vand.u32 4294901760, %v991_v33 }
 0x13b   : > { %v6100_v4 = vsub.f32 %v990_v39, %v6092_v52  ;;  %4081 = vmatmul.mubr.f32.gmra.mrb[6].mxu1 %v1191_v32  ;;  %4323 = vmatprep.mubr.f32.mxu0 %v1199_v3  ;;  %v1200_v17 = vsub.f32 %v6090_v24, %v1199_v3  ;;  %v526_v51 = vpop.xlane.xlu1 %525  ;;  %v915_v44 = vmul.f32 %v5004_v36, %v883_v6  ;;  %v5006_v20 = vpop.eup %5005  ;;  %v6112_v46 = vmul.f32 0.0078125, %v524_v55 }
 0x13c   : > { %v791_v39 = vmax.f32 %v759_v30, 0.0  ;;  %v792_v48 = vmax.f32 %v760_v54, 0.0  ;;  %v6114_v26 = vmul.f32 0.0078125, %v526_v51  ;;  %v6117_v14 = vsub.f32 %v991_v33, %v6106_v15 }
 0x13d   : > { %7021 = vst [vmem:[#allocation45_spill] sm:$0xff] %v6100_v4  ;;  %v1209_v43 = vand.u32 4294901760, %v6100_v4  ;;  %v1201_v22 = vand.u32 4294901760, %v1200_v17  ;;  %v953_v25 = vmul.f32 %v5834_v40, %v914_v7  ;;  %v7023_v6 = vand.u32 4294901760, %v5620_v62 }
 0x13e   : > { %7022 = vst [vmem:[#allocation46_spill] sm:$0xff] %v6117_v14  ;;  %v823_v58 = vadd.f32 1e-05, %v791_v39  ;;  %v824_v49 = vadd.f32 1e-05, %v792_v48  ;;  %v729_v3 = vmul.f32 %v6112_v46, %v6112_v46  ;;  %v730_v33 = vmul.f32 %v6114_v26, %v6114_v26  ;;  %v652_v30 = vpop.xlane.xlu0 %651 }
 0x13f   : > { %4324 = vmatmul.mubr.f32.gmra.mrb[8].mxu0 %v1209_v43  ;;  %v6125_v32 = vsub.f32 %v5620_v62, %v7023_v6  ;;  %4083 = vmatprep.mubr.f32.mxu1 %v1201_v22  ;;  %v1210_v36 = vsub.f32 %v6100_v4, %v1209_v43  ;;  %v1219_v54 = vand.u32 4294901760, %v6117_v14  ;;  %v654_v7 = vpop.xlane.xlu1 %653  ;;  %v697_v55 = vmul.f32 0.0078125, %v652_v30  ;;  %v7024_v62 = vld [vmem:[#allocation20_spill] sm:$0xff] }
 0x140   : > { %5011 = vrsqrt.f32 %v823_v58  ;;  %v698_v17 = vmul.f32 0.0078125, %v654_v7  ;;  %v992_v51 = vadd.f32 %v5848_v12, %v953_v25  ;;  %v954_v6 = vmul.f32 %v5834_v40, %v915_v44 }
 0x141   : > { %v1211_v48 = vand.u32 4294901760, %v1210_v36  ;;  %4326 = vmatprep.mubr.f32.mxu0 %v1219_v54  ;;  %v1220_v22 = vsub.f32 %v6117_v14, %v1219_v54  ;;  %v761_v43 = vsub.f32 %v697_v55, %v729_v3  ;;  %v916_v58 = vmul.f32 %v5006_v20, %v884_v16 }
 0x142   : > { %v5008_v57 = vpop.eup %5007  ;;  %v762_v27 = vsub.f32 %v698_v17, %v730_v33  ;;  %v6138_v8 = vand.u32 4294901760, %v992_v51  ;;  %5013 = vrsqrt.f32 %v824_v49  ;;  %v528_v25 = vpop.xlane.xlu0 %527  ;;  %v993_v36 = vadd.f32 %v5848_v12, %v954_v6 }
 0x143   : > { %4084 = vmatmul.mubr.f32.gmra.mrb[8].mxu1 %v1211_v48  ;;  %v1221_v30 = vand.u32 4294901760, %v1220_v22  ;;  %v530_v7 = vpop.xlane.xlu1 %529  ;;  %v917_v44 = vmul.f32 %v5008_v57, %v885_v41  ;;  %v793_v54 = vmax.f32 %v761_v43, 0.0  ;;  %v6150_v55 = vmul.f32 0.0078125, %v528_v25 }
 0x144   : > { %v794_v3 = vmax.f32 %v762_v27, 0.0  ;;  %v6148_v33 = vsub.f32 %v992_v51, %v6138_v8  ;;  %v5010_v60 = vpop.eup %5009  ;;  %v6152_v5 = vmul.f32 0.0078125, %v530_v7  ;;  %v6154_v16 = vand.u32 4294901760, %v993_v36 }
 0x145   : > { %4086 = vmatprep.mubr.f32.mxu1 %v1221_v30  ;;  %v955_v20 = vmul.f32 %v5834_v40, %v916_v58  ;;  %v956_v49 = vmul.f32 %v5834_v40, %v917_v44  ;;  %v825_v53 = vadd.f32 1e-05, %v793_v54  ;;  %v731_v17 = vmul.f32 %v6150_v55, %v6150_v55 }
 0x146   : > { %7025 = vst [vmem:[#allocation20_spill] sm:$0xff] %v6148_v33  ;;  %v826_v41 = vadd.f32 1e-05, %v794_v3  ;;  %v1229_v27 = vand.u32 4294901760, %v6148_v33  ;;  %v732_v51 = vmul.f32 %v6152_v5, %v6152_v5  ;;  %v656_v48 = vpop.xlane.xlu0 %655  ;;  %v6166_v22 = vsub.f32 %v993_v36, %v6154_v16 }
 0x147   : > { %v658_v6 = vpop.xlane.xlu1 %657  ;;  %5015 = vrsqrt.f32 %v825_v53  ;;  %v699_v25 = vmul.f32 0.0078125, %v656_v48  ;;  %v994_v44 = vadd.f32 %v5848_v12, %v955_v20  ;;  %v995_v54 = vadd.f32 %v5848_v12, %v956_v49 }
 0x148   : > { %7027 = vst [vmem:[#allocation21_spill] sm:$0xff] %v6166_v22  ;;  %4327 = vmatmul.mubr.f32.gmra.mrb[10].mxu0 %v1229_v27  ;;  %v1230_v58 = vsub.f32 %v6148_v33, %v1229_v27  ;;  %v700_v30 = vmul.f32 0.0078125, %v658_v6  ;;  %5017 = vrsqrt.f32 %v826_v41  ;;  %v1239_v7 = vand.u32 4294901760, %v6166_v22 }
 0x149   : > { %v763_v36 = vsub.f32 %v699_v25, %v731_v17  ;;  %v918_v53 = vmul.f32 %v5010_v60, %v886_v35  ;;  %v6176_v43 = vand.u32 4294901760, %v994_v44  ;;  %v6179_v20 = vand.u32 4294901760, %v995_v54 }
 0x14a   : > { %v5012_v3 = vpop.eup %5011  ;;  %v1231_v57 = vand.u32 4294901760, %v1230_v58  ;;  %v764_v39 = vsub.f32 %v700_v30, %v732_v51  ;;  %4329 = vmatprep.mubr.f32.mxu0 %v1239_v7  ;;  %v532_v27 = vpop.xlane.xlu0 %531  ;;  %v1240_v41 = vsub.f32 %v6166_v22, %v1239_v7  ;;  %v7028_v49 = vsub.f32 %v5657_v37, %v6069_v47  ;;  %v6196_v7 = vld [vmem:[%s5422_s18 + $0xa0] sm:$0xff]  ;;  %v6201_v47 = vld [vmem:[%s5422_s18 + $0xa8] sm:$0xff] }
 0x14b   : > { %v534_v48 = vpop.xlane.xlu1 %533  ;;  %v795_v51 = vmax.f32 %v763_v36, 0.0  ;;  %v6184_v11 = vmul.f32 0.0078125, %v532_v27  ;;  %v6189_v60 = vsub.f32 %v994_v44, %v6176_v43  ;;  %v6192_v25 = vsub.f32 %v995_v54, %v6179_v20 }
 0x14c   : > { %v919_v17 = vmul.f32 %v5012_v3, %v7028_v49  ;;  %4087 = vmatmul.mubr.f32.gmra.mrb[10].mxu1 %v1231_v57  ;;  %v796_v6 = vmax.f32 %v764_v39, 0.0  ;;  %v6186_v45 = vmul.f32 0.0078125, %v534_v48  ;;  %v5014_v35 = vpop.eup %5013  ;;  %v1241_v58 = vand.u32 4294901760, %v1240_v41 }
 0x14d   : > { %7029 = vst [vmem:[#allocation47_spill] sm:$0xff] %v6189_v60  ;;  %7030 = vst [vmem:[#allocation48_spill] sm:$0xff] %v6192_v25  ;;  %v957_v30 = vmul.f32 %v5834_v40, %v918_v53  ;;  %v827_v57 = vadd.f32 1e-05, %v795_v51  ;;  %v1249_v44 = vand.u32 4294901760, %v6189_v60  ;;  %v733_v54 = vmul.f32 %v6184_v11, %v6184_v11 }
 0x14e   : > { %v828_v3 = vadd.f32 1e-05, %v796_v6  ;;  %4089 = vmatprep.mubr.f32.mxu1 %v1241_v58  ;;  %v734_v36 = vmul.f32 %v6186_v45, %v6186_v45  ;;  %v660_v53 = vpop.xlane.xlu0 %659  ;;  %v1259_v27 = vand.u32 4294901760, %v6192_v25  ;;  %v958_v58 = vmul.f32 %v5834_v40, %v919_v17 }
 0x14f   : > { %v662_v41 = vpop.xlane.xlu1 %661  ;;  %5019 = vrsqrt.f32 %v827_v57  ;;  %v701_v48 = vmul.f32 0.0078125, %v660_v53  ;;  %v996_v39 = vadd.f32 %v5848_v12, %v957_v30  ;;  %4330 = vmatmul.mubr.f32.gmra.mrb[12].mxu0 %v1249_v44  ;;  %v1250_v51 = vsub.f32 %v6189_v60, %v1249_v44 }
 0x150   : > { %v702_v49 = vmul.f32 0.0078125, %v662_v41  ;;  %5021 = vrsqrt.f32 %v828_v3  ;;  %v1260_v6 = vsub.f32 %v6192_v25, %v1259_v27  ;;  %4332 = vmatprep.mubr.f32.mxu0 %v1259_v27  ;;  %v7031_v57 = vsub.f32 %v5660_v38, %v6073_v42 }
 0x151   : > { %v5016_v37 = vpop.eup %5015  ;;  %v765_v22 = vsub.f32 %v701_v48, %v733_v54  ;;  %v6215_v14 = vand.u32 4294901760, %v996_v39  ;;  %v1251_v30 = vand.u32 4294901760, %v1250_v51  ;;  %v997_v25 = vadd.f32 %v5848_v12, %v958_v58 }
 0x152   : > { %v766_v33 = vsub.f32 %v702_v49, %v734_v36  ;;  %v920_v53 = vmul.f32 %v5014_v35, %v7031_v57  ;;  %v5018_v41 = vpop.eup %5017  ;;  %v536_v3 = vpop.xlane.xlu0 %535  ;;  %v1261_v4 = vand.u32 4294901760, %v1260_v6  ;;  %v7032_v17 = vsub.f32 %v7024_v62, %v6112_v46  ;;  %v6236_v6 = vld [vmem:[%s5422_s18 + $0xb0] sm:$0xff] }
 0x153   : > { %v538_v44 = vpop.xlane.xlu1 %537  ;;  %v797_v36 = vmax.f32 %v765_v22, 0.0  ;;  %v6225_v48 = vsub.f32 %v996_v39, %v6215_v14  ;;  %v6227_v38 = vmul.f32 0.0078125, %v536_v3  ;;  %4090 = vmatmul.mubr.f32.gmra.mrb[12].mxu1 %v1251_v30  ;;  %v6231_v35 = vand.u32 4294901760, %v997_v25 }
 0x154   : > { %v921_v54 = vmul.f32 %v5016_v37, %v7032_v17  ;;  %v798_v27 = vmax.f32 %v766_v33, 0.0  ;;  %v6229_v42 = vmul.f32 0.0078125, %v538_v44  ;;  %v959_v49 = vmul.f32 %v5834_v40, %v920_v53  ;;  %4092 = vmatprep.mubr.f32.mxu1 %v1261_v4  ;;  %v6242_v37 = vld [vmem:[%s5422_s18 + $0xb8] sm:$0xff] }
 0x155   : > { %7033 = vst [vmem:[#allocation49_spill] sm:$0xff] %v6225_v48  ;;  %v829_v62 = vadd.f32 1e-05, %v797_v36  ;;  %v1269_v22 = vand.u32 4294901760, %v6225_v48  ;;  %v735_v58 = vmul.f32 %v6227_v38, %v6227_v38  ;;  %v6251_v30 = vsub.f32 %v997_v25, %v6231_v35 }
 0x156   : > { %v960_v51 = vmul.f32 %v5834_v40, %v921_v54  ;;  %v830_v33 = vadd.f32 1e-05, %v798_v27  ;;  %v736_v57 = vmul.f32 %v6229_v42, %v6229_v42  ;;  %v664_v53 = vpop.xlane.xlu0 %663  ;;  %v998_v36 = vadd.f32 %v5848_v12, %v959_v49 }
 0x157   : > { %7034 = vst [vmem:[#allocation50_spill] sm:$0xff] %v6251_v30  ;;  %v666_v3 = vpop.xlane.xlu1 %665  ;;  %5023 = vrsqrt.f32 %v829_v62  ;;  %4333 = vmatmul.mubr.f32.gmra.mrb[14].mxu0 %v1269_v22  ;;  %v1270_v4 = vsub.f32 %v6225_v48, %v1269_v22  ;;  %v703_v44 = vmul.f32 0.0078125, %v664_v53  ;;  %v1279_v54 = vand.u32 4294901760, %v6251_v30 }
 0x158   : > { %v704_v17 = vmul.f32 0.0078125, %v666_v3  ;;  %5025 = vrsqrt.f32 %v830_v33  ;;  %v999_v27 = vadd.f32 %v5848_v12, %v960_v51  ;;  %v7035_v25 = vsub.f32 %v7026_v10, %v6114_v26 }
 0x159   : > { %v5020_v39 = vpop.eup %5019  ;;  %v1271_v46 = vand.u32 4294901760, %v1270_v4  ;;  %v767_v60 = vsub.f32 %v703_v44, %v735_v58  ;;  %4335 = vmatprep.mubr.f32.mxu0 %v1279_v54  ;;  %v6260_v22 = vand.u32 4294901760, %v998_v36  ;;  %v1280_v53 = vsub.f32 %v6251_v30, %v1279_v54 }
 0x15a   : > { %v768_v24 = vsub.f32 %v704_v17, %v736_v57  ;;  %v922_v62 = vmul.f32 %v5018_v41, %v7035_v25  ;;  %v5022_v1 = vpop.eup %5021  ;;  %v540_v33 = vpop.xlane.xlu0 %539  ;;  %v6263_v3 = vand.u32 4294901760, %v999_v27  ;;  %v7036_v51 = vsub.f32 %v6196_v7, %v6150_v55  ;;  %v6280_v25 = vld [vmem:[%s5422_s18 + $0xc0] sm:$0xff] }
 0x15b   : > { %v542_v49 = vpop.xlane.xlu1 %541  ;;  %4093 = vmatmul.mubr.f32.gmra.mrb[14].mxu1 %v1271_v46  ;;  %v799_v57 = vmax.f32 %v767_v60, 0.0  ;;  %v6268_v10 = vmul.f32 0.0078125, %v540_v33  ;;  %v6273_v4 = vsub.f32 %v998_v36, %v6260_v22  ;;  %v1281_v44 = vand.u32 4294901760, %v1280_v53  ;;  %v6285_v60 = vld [vmem:[%s5422_s18 + $0xc8] sm:$0xff] }
 0x15c   : > { %v923_v58 = vmul.f32 %v5020_v39, %v7036_v51  ;;  %v800_v26 = vmax.f32 %v768_v24, 0.0  ;;  %v6270_v41 = vmul.f32 0.0078125, %v542_v49  ;;  %v6276_v17 = vsub.f32 %v999_v27, %v6263_v3 }
 0x15d   : > { %7037 = vst [vmem:[#allocation51_spill] sm:$0xff] %v6273_v4  ;;  %v961_v54 = vmul.f32 %v5834_v40, %v922_v62  ;;  %v831_v7 = vadd.f32 1e-05, %v799_v57  ;;  %v1289_v39 = vand.u32 4294901760, %v6273_v4  ;;  %v737_v36 = vmul.f32 %v6268_v10, %v6268_v10  ;;  %4095 = vmatprep.mubr.f32.mxu1 %v1281_v44 }
 0x15e   : > { %7038 = vst [vmem:[#allocation52_spill] sm:$0xff] %v6276_v17  ;;  %v832_v46 = vadd.f32 1e-05, %v800_v26  ;;  %v738_v27 = vmul.f32 %v6270_v41, %v6270_v41  ;;  %v668_v62 = vpop.xlane.xlu0 %667  ;;  %v1299_v33 = vand.u32 4294901760, %v6276_v17  ;;  %v962_v44 = vmul.f32 %v5834_v40, %v923_v58 }
 0x15f   : > { %v670_v53 = vpop.xlane.xlu1 %669  ;;  %5027 = vrsqrt.f32 %v831_v7  ;;  %v705_v49 = vmul.f32 0.0078125, %v668_v62  ;;  %v1000_v24 = vadd.f32 %v5848_v12, %v961_v54  ;;  %4336 = vmatmul.mubr.f32.gmra.mrb[16].mxu0 %v1289_v39  ;;  %v1290_v57 = vsub.f32 %v6273_v4, %v1289_v39 }
 0x160   : > { %v706_v51 = vmul.f32 0.0078125, %v670_v53  ;;  %5029 = vrsqrt.f32 %v832_v46  ;;  %v1300_v26 = vsub.f32 %v6276_v17, %v1299_v33  ;;  %4338 = vmatprep.mubr.f32.mxu0 %v1299_v33  ;;  %v7039_v7 = vsub.f32 %v6201_v47, %v6152_v5 }
 0x161   : > { %v5024_v55 = vpop.eup %5023  ;;  %v769_v30 = vsub.f32 %v705_v49, %v737_v36  ;;  %v6299_v9 = vand.u32 4294901760, %v1000_v24  ;;  %v1291_v54 = vand.u32 4294901760, %v1290_v57  ;;  %v1001_v17 = vadd.f32 %v5848_v12, %v962_v44 }
 0x162   : > { %v770_v48 = vsub.f32 %v706_v51, %v738_v27  ;;  %v924_v62 = vmul.f32 %v5022_v1, %v7039_v7  ;;  %v5026_v53 = vpop.eup %5025  ;;  %v544_v46 = vpop.xlane.xlu0 %543  ;;  %v1301_v29 = vand.u32 4294901760, %v1300_v26  ;;  %v7040_v58 = vsub.f32 %v6236_v6, %v6184_v11  ;;  %v6320_v26 = vld [vmem:[%s5422_s18 + $0xd0] sm:$0xff] }
 0x163   : > { %v546_v39 = vpop.xlane.xlu1 %545  ;;  %v801_v27 = vmax.f32 %v769_v30, 0.0  ;;  %v6309_v49 = vsub.f32 %v1000_v24, %v6299_v9  ;;  %v6311_v5 = vmul.f32 0.0078125, %v544_v46  ;;  %4096 = vmatmul.mubr.f32.gmra.mrb[16].mxu1 %v1291_v54  ;;  %v6315_v47 = vand.u32 4294901760, %v1001_v17 }
 0x164   : > { %v925_v36 = vmul.f32 %v5024_v55, %v7040_v58  ;;  %v802_v33 = vmax.f32 %v770_v48, 0.0  ;;  %v6313_v1 = vmul.f32 0.0078125, %v546_v39  ;;  %v963_v51 = vmul.f32 %v5834_v40, %v924_v62  ;;  %4098 = vmatprep.mubr.f32.mxu1 %v1301_v29  ;;  %v6326_v55 = vld [vmem:[%s5422_s18 + $0xd8] sm:$0xff] }
 0x165   : > { %7041 = vst [vmem:[#allocation53_spill] sm:$0xff] %v6309_v49  ;;  %v833_v48 = vadd.f32 1e-05, %v801_v27  ;;  %v1309_v30 = vand.u32 4294901760, %v6309_v49  ;;  %v739_v44 = vmul.f32 %v6311_v5, %v6311_v5  ;;  %v6335_v62 = vsub.f32 %v1001_v17, %v6315_v47 }
 0x166   : > { %v964_v57 = vmul.f32 %v5834_v40, %v925_v36  ;;  %v834_v6 = vadd.f32 1e-05, %v802_v33  ;;  %v740_v40 = vmul.f32 %v6313_v1, %v6313_v1  ;;  %v672_v7 = vpop.xlane.xlu0 %671  ;;  %v1002_v36 = vadd.f32 %v5848_v12, %v963_v51 }
 0x167   : > { %7042 = vst [vmem:[#allocation54_spill] sm:$0xff] %v6335_v62  ;;  %v674_v54 = vpop.xlane.xlu1 %673  ;;  %5031 = vrsqrt.f32 %v833_v48  ;;  %4339 = vmatmul.mubr.f32.gmra.mrb[18].mxu0 %v1309_v30  ;;  %v1310_v29 = vsub.f32 %v6309_v49, %v1309_v30  ;;  %v707_v46 = vmul.f32 0.0078125, %v672_v7  ;;  %v1319_v58 = vand.u32 4294901760, %v6335_v62 }
 0x168   : > { %v708_v39 = vmul.f32 0.0078125, %v674_v54  ;;  %5033 = vrsqrt.f32 %v834_v6  ;;  %v1003_v27 = vadd.f32 %v5848_v12, %v964_v57  ;;  %v7043_v17 = vsub.f32 %v6242_v37, %v6186_v45 }
 0x169   : > { %v5028_v33 = vpop.eup %5027  ;;  %v1311_v24 = vand.u32 4294901760, %v1310_v29  ;;  %v771_v11 = vsub.f32 %v707_v46, %v739_v44  ;;  %4341 = vmatprep.mubr.f32.mxu0 %v1319_v58  ;;  %v6344_v30 = vand.u32 4294901760, %v1002_v36  ;;  %v1320_v7 = vsub.f32 %v6335_v62, %v1319_v58 }
 0x16a   : > { %v772_v4 = vsub.f32 %v708_v39, %v740_v40  ;;  %v926_v48 = vmul.f32 %v5026_v53, %v7043_v17  ;;  %v5030_v34 = vpop.eup %5029  ;;  %v548_v6 = vpop.xlane.xlu0 %547  ;;  %v6347_v54 = vand.u32 4294901760, %v1003_v27  ;;  %v7044_v12 = vsub.f32 %v6280_v25, %v6227_v38  ;;  %v6365_v39 = vld [vmem:[%s6870_s3] ss:$0 sm:$0xff] }
 0x16b   : > { %v550_v51 = vpop.xlane.xlu1 %549  ;;  %4099 = vmatmul.mubr.f32.gmra.mrb[18].mxu1 %v1311_v24  ;;  %v803_v44 = vmax.f32 %v771_v11, 0.0  ;;  %v6352_v37 = vmul.f32 0.0078125, %v548_v6  ;;  %v6357_v40 = vsub.f32 %v1002_v36, %v6344_v30  ;;  %v1321_v29 = vand.u32 4294901760, %v1320_v7  ;;  %v6369_v25 = vld [vmem:[%s5422_s18 + $0xe0] sm:$0xff]  ;;  %v6374_v11 = vld [vmem:[%s5422_s18 + $0xe8] sm:$0xff] }
 0x16c   : > { %v927_v57 = vmul.f32 %v5028_v33, %v7044_v12  ;;  %v804_v45 = vmax.f32 %v772_v4, 0.0  ;;  %v6354_v53 = vmul.f32 0.0078125, %v550_v51  ;;  %v6360_v46 = vsub.f32 %v1003_v27, %v6347_v54 }
 0x16d   : > { %7045 = vst [vmem:[#allocation55_spill] sm:$0xff] %v6357_v40  ;;  %v965_v38 = vmul.f32 %v6365_v39, %v926_v48  ;;  %v835_v58 = vadd.f32 1e-05, %v803_v44  ;;  %v1329_v27 = vand.u32 4294901760, %v6357_v40  ;;  %v741_v33 = vmul.f32 %v6352_v37, %v6352_v37  ;;  %4101 = vmatprep.mubr.f32.mxu1 %v1321_v29  ;;  %v6387_v44 = vld [vmem:[%s6871_s4] ss:$0 sm:$0xff] }
 0x16e   : > { %7046 = vst [vmem:[#allocation56_spill] sm:$0xff] %v6360_v46  ;;  %v836_v36 = vadd.f32 1e-05, %v804_v45  ;;  %v742_v17 = vmul.f32 %v6354_v53, %v6354_v53  ;;  %v676_v48 = vpop.xlane.xlu0 %675  ;;  %v1339_v6 = vand.u32 4294901760, %v6360_v46  ;;  %v966_v4 = vmul.f32 %v6365_v39, %v927_v57 }
 0x16f   : > { %v678_v7 = vpop.xlane.xlu1 %677  ;;  %5035 = vrsqrt.f32 %v835_v58  ;;  %v709_v51 = vmul.f32 0.0078125, %v676_v48  ;;  %v1004_v45 = vadd.f32 %v6387_v44, %v965_v38  ;;  %4342 = vmatmul.mubr.f32.gmra.mrb[20].mxu0 %v1329_v27  ;;  %v1330_v29 = vsub.f32 %v6357_v40, %v1329_v27 }
 0x170   : > { %v710_v12 = vmul.f32 0.0078125, %v678_v7  ;;  %5037 = vrsqrt.f32 %v836_v36  ;;  %v1340_v24 = vsub.f32 %v6360_v46, %v1339_v6  ;;  %4344 = vmatprep.mubr.f32.mxu0 %v1339_v6  ;;  %v7047_v7 = vsub.f32 %v6285_v60, %v6229_v42 }
 0x171   : > { %v5032_v62 = vpop.eup %5031  ;;  %v773_v49 = vsub.f32 %v709_v51, %v741_v33  ;;  %v6393_v48 = vand.u32 4294901760, %v1004_v45  ;;  %v1331_v38 = vand.u32 4294901760, %v1330_v29  ;;  %v1005_v0 = vadd.f32 %v6387_v44, %v966_v4 }
 0x172   : > { %v774_v58 = vsub.f32 %v710_v12, %v742_v17  ;;  %v928_v23 = vmul.f32 %v5030_v34, %v7047_v7  ;;  %v5034_v18 = vpop.eup %5033  ;;  %v1341_v36 = vand.u32 4294901760, %v1340_v24  ;;  %v7048_v27 = vsub.f32 %v6320_v26, %v6268_v10 }
 0x173   : > { %v805_v57 = vmax.f32 %v773_v49, 0.0  ;;  %v6403_v33 = vsub.f32 %v1004_v45, %v6393_v48  ;;  %4102 = vmatmul.mubr.f32.gmra.mrb[20].mxu1 %v1331_v38  ;;  %v6406_v6 = vand.u32 4294901760, %v1005_v0  ;;  %v7049_v42 = vsub.f32 %v6326_v55, %v6270_v41 }
 0x174   : > { %v929_v46 = vmul.f32 %v5032_v62, %v7048_v27  ;;  %v806_v40 = vmax.f32 %v774_v58, 0.0  ;;  %v967_v17 = vmul.f32 %v6365_v39, %v928_v23  ;;  %v7050_v4 = vand.u32 4294901760, %v6125_v32  ;;  %4104 = vmatprep.mubr.f32.mxu1 %v1341_v36 }
 0x175   : > { %v930_v60 = vmul.f32 %v5034_v18, %v7049_v42  ;;  %v837_v49 = vadd.f32 1e-05, %v805_v57  ;;  %v1349_v62 = vand.u32 4294901760, %v6403_v33  ;;  %v6418_v24 = vsub.f32 %v1005_v0, %v6406_v6 }
 0x176   : > { %v968_v34 = vmul.f32 %v6365_v39, %v929_v46  ;;  %v1546_v10 = vsub.f32 %v6125_v32, %v7050_v4  ;;  %v838_v26 = vadd.f32 1e-05, %v806_v40  ;;  %v1006_v23 = vadd.f32 %v6387_v44, %v967_v17  ;;  %v7054_v17 = vld [vmem:[#allocation22_spill] sm:$0xff] }
 0x177   : > { %v969_v51 = vmul.f32 %v6365_v39, %v930_v60  ;;  %5039 = vrsqrt.f32 %v837_v49  ;;  %4345 = vmatmul.mubr.f32.gmra.mrb[22].mxu0 %v1349_v62  ;;  %v1350_v18 = vsub.f32 %v6403_v33, %v1349_v62  ;;  %v7051_v40 = vand.u32 4294901760, %v5884_v56 }
 0x178   : > { %v1007_v46 = vadd.f32 %v6387_v44, %v968_v34  ;;  %v1547_v41 = vand.u32 4294901760, %v1546_v10  ;;  %v6423_v55 = vand.u32 4294901760, %v1006_v23  ;;  %v7052_v12 = vmov %v7050_v4  ;;  %v7055_v34 = vld [vmem:[#allocation23_spill] sm:$0xff] }
 0x179   : > { %v4675_v45 = vpack.c.bf16 %v7052_v12, %v7051_v40  ;;  %5041 = vrsqrt.f32 %v838_v26  ;;  %v1359_v0 = vand.u32 4294901760, %v6418_v24  ;;  %v1008_v58 = vadd.f32 %v6387_v44, %v969_v51  ;;  %v5036_v7 = vpop.eup %5035 }
 0x17a   : > { %v6430_v29 = vand.u32 4294901760, %v1007_v46  ;;  %v1351_v38 = vand.u32 4294901760, %v1350_v18  ;;  %v6434_v36 = vsub.f32 %v1006_v23, %v6423_v55  ;;  %v7053_v27 = vand.u32 4294901760, %v6019_v2  ;;  %v5038_v60 = vpop.eup %5037 }
 0x17b   : > { %4676 = vmatprep.subr.bf16.mxu0 %v4675_v45  ;;  %v6440_v42 = vpack.c.bf16 %v7055_v34, %v7054_v17  ;;  %4347 = vmatprep.mubr.f32.mxu0 %v1359_v0  ;;  %v1360_v4 = vsub.f32 %v6418_v24, %v1359_v0  ;;  %v6446_v49 = vand.u32 4294901760, %v1008_v58  ;;  %v7056_v26 = vsub.f32 %v6369_v25, %v6311_v5  ;;  %v7058_v5 = vld [vmem:[#allocation12_spill] sm:$0xff] }
 0x17c   : > { %v4579_v57 = vpack.c.bf16 %v1547_v41, %v7053_v27  ;;  %v6444_v10 = vsub.f32 %v1007_v46, %v6430_v29  ;;  %4678 = vmatpush3.bf16.msra.mxu0 %v4675_v45  ;;  %4105 = vmatmul.mubr.f32.gmra.mrb[22].mxu1 %v1351_v38  ;;  %v1369_v2 = vand.u32 4294901760, %v6434_v36  ;;  %v7057_v23 = vsub.f32 %v6374_v11, %v6313_v1 }
 0x17d   : > { %v931_v62 = vmul.f32 %v5036_v7, %v7056_v26  ;;  %v1361_v41 = vand.u32 4294901760, %v1360_v4  ;;  %v6457_v46 = vsub.f32 %v1008_v58, %v6446_v49  ;;  %4680 = vmatprep.subr.bf16.mxu0 %v7058_v5  ;;  %v5061_v7 = vld [vmem:[%s5422_s18 + $0xf0] sm:$0xff] }
 0x17e   : > { %v932_v51 = vmul.f32 %v5038_v60, %v7057_v23  ;;  %4580 = vmatprep.subr.bf16.mxu1 %v4579_v57  ;;  %v1379_v18 = vand.u32 4294901760, %v6444_v10  ;;  %4348 = vmatmul.mubr.f32.gmra.mrb[24].mxu0 %v1369_v2  ;;  %v1370_v25 = vsub.f32 %v6434_v36, %v1369_v2  ;;  %v901_v38 = vsub.f32 %v5061_v7, %v6352_v37  ;;  %v5062_v60 = vld [vmem:[%s5422_s18 + $0xf8] sm:$0xff] }
 0x17f   : > { %v970_v40 = vmul.f32 %v6365_v39, %v931_v62  ;;  %4582 = vmatpush3.bf16.msra.mxu1 %v4579_v57  ;;  %4107 = vmatprep.mubr.f32.mxu1 %v1361_v41  ;;  %v1389_v11 = vand.u32 4294901760, %v6457_v46  ;;  %v902_v4 = vsub.f32 %v5062_v60, %v6354_v53 }
 0x180   : > { %v971_v1 = vmul.f32 %v6365_v39, %v932_v51  ;;  %4584 = vmatprep.subr.bf16.mxu1 %v6440_v42  ;;  %4350 = vmatprep.mubr.f32.mxu0 %v1379_v18  ;;  %v1380_v12 = vsub.f32 %v6444_v10, %v1379_v18  ;;  %v1371_v0 = vand.u32 4294901760, %v1370_v25 }
 0x181   : > { %v1009_v45 = vadd.f32 %v6387_v44, %v970_v40  ;;  %v1390_v57 = vsub.f32 %v6457_v46, %v1389_v11  ;;  %v5040_v34 = vpop.eup %5039 }
 0x182   : > { %v1010_v58 = vadd.f32 %v6387_v44, %v971_v1  ;;  %v1381_v27 = vand.u32 4294901760, %v1380_v12  ;;  %4108 = vmatmul.mubr.f32.gmra.mrb[24].mxu1 %v1371_v0  ;;  %4351 = vmatmul.mubr.f32.gmra.mrb[26].mxu0 %v1389_v11  ;;  %v933_v37 = vmul.f32 %v5040_v34, %v901_v38 }
 0x183   : > { %v6471_v17 = vand.u32 4294901760, %v1009_v45  ;;  %v5042_v62 = vpop.eup %5041  ;;  %v1391_v2 = vand.u32 4294901760, %v1390_v57 }
 0x184   : > { %v6475_v26 = vand.u32 4294901760, %v1010_v58  ;;  %4110 = vmatprep.mubr.f32.mxu1 %v1381_v27  ;;  %v934_v41 = vmul.f32 %v5042_v62, %v902_v4  ;;  %v972_v40 = vmul.f32 %v6365_v39, %v933_v37  ;;  %v7059_v4 = vld [vmem:[#allocation35_spill] sm:$0xff]  ;;  %v7060_v37 = vld [vmem:[#allocation24_spill] sm:$0xff] }
 0x185   : > { %v6478_v23 = vsub.f32 %v1009_v45, %v6471_v17 }
 0x186   : > { %v6481_v51 = vsub.f32 %v1010_v58, %v6475_v26  ;;  %4111 = vmatmul.mubr.f32.gmra.mrb[26].mxu1 %v1391_v2  ;;  %v973_v25 = vmul.f32 %v6365_v39, %v934_v41  ;;  %v1011_v11 = vadd.f32 %v6387_v44, %v972_v40  ;;  %v7061_v41 = vld [vmem:[#allocation25_spill] sm:$0xff] }
 0x187   : > { %v1399_v18 = vand.u32 4294901760, %v6478_v23  ;;  %v7062_v40 = vld [vmem:[#allocation13_spill] sm:$0xff] }
 0x188   : > { %v1409_v53 = vand.u32 4294901760, %v6481_v51  ;;  %v1012_v45 = vadd.f32 %v6387_v44, %v973_v25  ;;  %v6491_v58 = vand.u32 4294901760, %v1011_v11 }
 0x189   : > { %4353 = vmatprep.mubr.f32.mxu0 %v1399_v18  ;;  %v1400_v1 = vsub.f32 %v6478_v23, %v1399_v18  ;;  %v4587_v18 = vpack.c.bf16 %v7061_v41, %v7060_v37  ;;  %v7075_v37 = vld [vmem:[#allocation34_spill] sm:$0xff] }
 0x18a   : > { %4354 = vmatmul.mubr.f32.gmra.mrb[28].mxu0 %v1409_v53  ;;  %v1410_v12 = vsub.f32 %v6481_v51, %v1409_v53  ;;  %v6493_v38 = vand.u32 4294901760, %v1012_v45  ;;  %v6496_v27 = vsub.f32 %v1011_v11, %v6491_v58  ;;  %v7063_v53 = vld [vmem:[#allocation26_spill] sm:$0xff]  ;;  %v7067_v11 = vld [vmem:[#allocation29_spill] sm:$0xff]  ;;  %v4607_v41 = vpack.c.bf16 %v7075_v37, %v5829_v31  ;;  %v7077_v31 = vld [vmem:[#allocation19_spill] sm:$0xff] }
 0x18b   : > { %v1401_v0 = vand.u32 4294901760, %v1400_v1  ;;  %v7066_v1 = vld [vmem:[#allocation28_spill] sm:$0xff] }
 0x18c   : > { %v1411_v7 = vand.u32 4294901760, %v1410_v12  ;;  %v6499_v39 = vsub.f32 %v1012_v45, %v6493_v38  ;;  %v1419_v57 = vand.u32 4294901760, %v6496_v27  ;;  %v4595_v12 = vpack.c.bf16 %v7067_v11, %v7066_v1  ;;  %v7068_v45 = vld [vmem:[#allocation15_spill] sm:$0xff] }
 0x18d   : > { %4113 = vmatprep.mubr.f32.mxu1 %v1401_v0  ;;  %v7069_v0 = vld [vmem:[#allocation30_spill] sm:$0xff] }
 0x18e   : > { %4114 = vmatmul.mubr.f32.gmra.mrb[28].mxu1 %v1411_v7  ;;  %v1429_v34 = vand.u32 4294901760, %v6499_v39  ;;  %4356 = vmatprep.mubr.f32.mxu0 %v1419_v57  ;;  %v1420_v44 = vsub.f32 %v6496_v27, %v1419_v57  ;;  %v7070_v7 = vld [vmem:[#allocation31_spill] sm:$0xff] }
 0x18f   : > { %v4599_v57 = vpack.c.bf16 %v7070_v7, %v7069_v0 }
 0x190   : > { %4357 = vmatmul.mubr.f32.gmra.mrb[30].mxu0 %v1429_v34  ;;  %v1430_v60 = vsub.f32 %v6499_v39, %v1429_v34  ;;  %v1421_v62 = vand.u32 4294901760, %v1420_v44  ;;  %v7071_v34 = vld [vmem:[#allocation16_spill] sm:$0xff] }
 0x191   : > { %4391 = vmatprep.mubr.f32.mxu0 %v7059_v4  ;;  %v7072_v44 = vld [vmem:[#allocation32_spill] sm:$0xff] }
 0x192   : > { %v1431_v2 = vand.u32 4294901760, %v1430_v60  ;;  %4116 = vmatprep.mubr.f32.mxu1 %v1421_v62  ;;  %v7073_v60 = vld [vmem:[#allocation33_spill] sm:$0xff] }
 0x193   : > { %v4603_v62 = vpack.c.bf16 %v7073_v60, %v7072_v44 }
 0x194   : > { %4117 = vmatmul.mubr.f32.gmra.mrb[30].mxu1 %v1431_v2  ;;  %4392 = vmatmul.mubr.f32.vlgmr.msra.gmra.mrb[0].mxu0 %v5899_v21  ;;  %v7074_v2 = vld [vmem:[#allocation17_spill] sm:$0xff] }
 0x195   : > { %4151 = vmatprep.mubr.f32.mxu1 %v7059_v4  ;;  %4394 = vmatprep.mubr.f32.mxu0 %v5924_v50 }
 0x196   : > { %4682 = vmatpush3.bf16.msra.mxu0 %v7058_v5  ;;  %v7064_v5 = vld [vmem:[#allocation27_spill] sm:$0xff] }
 0x197   : > { %4684 = vmatprep.subr.bf16.mxu0 %v7062_v40  ;;  %v4591_v25 = vpack.c.bf16 %v7064_v5, %v7063_v53  ;;  %v7080_v53 = vld [vmem:[#allocation38_spill] sm:$0xff]  ;;  %v7081_v5 = vld [vmem:[#allocation39_spill] sm:$0xff] }
 0x198   : > { %4152 = vmatmul.mubr.f32.vlgmr.msra.gmra.mrb[0].mxu1 %v5899_v21  ;;  %4395 = vmatmul.mubr.f32.gmra.mrb[2].mxu0 %v5940_v61 }
 0x199   : > { %4586 = vmatpush3.bf16.msra.mxu1 %v6440_v42  ;;  %4154 = vmatprep.mubr.f32.mxu1 %v5924_v50  ;;  %v7065_v42 = vld [vmem:[#allocation14_spill] sm:$0xff] }
 0x19a   : > { %4397 = vmatprep.mubr.f32.mxu0 %v5966_v28  ;;  %4588 = vmatprep.subr.bf16.mxu1 %v4587_v18 }
 0x19b   : > { %4686 = vmatpush3.bf16.msra.mxu0 %v7062_v40  ;;  %v4611_v40 = vpack.c.bf16 %v6125_v32, %v5884_v56  ;;  %v7078_v56 = vld [vmem:[#allocation36_spill] sm:$0xff]  ;;  %v7079_v32 = vld [vmem:[#allocation37_spill] sm:$0xff] }
 0x19c   : > { %4155 = vmatmul.mubr.f32.gmra.mrb[2].mxu1 %v5940_v61  ;;  %4398 = vmatmul.mubr.f32.gmra.mrb[4].mxu0 %v6000_v13 }
 0x19d   : > { %4157 = vmatprep.mubr.f32.mxu1 %v5966_v28  ;;  %4400 = vmatprep.mubr.f32.mxu0 %v6013_v63 }
 0x19e   : > { %4590 = vmatpush3.bf16.msra.mxu1 %v4587_v18  ;;  %4688 = vmatprep.subr.bf16.mxu0 %v7065_v42  ;;  %v7076_v18 = vld [vmem:[#allocation18_spill] sm:$0xff] }
 0x19f   : > { %4592 = vmatprep.subr.bf16.mxu1 %v4591_v25  ;;  %4690 = vmatpush3.bf16.msra.mxu0 %v7065_v42 }
 0x1a0   : > { %4158 = vmatmul.mubr.f32.gmra.mrb[4].mxu1 %v6000_v13  ;;  %4401 = vmatmul.mubr.f32.gmra.mrb[6].mxu0 %v6048_v59 }
 0x1a1   : > { %4160 = vmatprep.mubr.f32.mxu1 %v6013_v63  ;;  %4403 = vmatprep.mubr.f32.mxu0 %v6075_v19 }
 0x1a2   : > { %4594 = vmatpush3.bf16.msra.mxu1 %v4591_v25  ;;  %4692 = vmatprep.subr.bf16.mxu0 %v7068_v45 }
 0x1a3   : > { %4596 = vmatprep.subr.bf16.mxu1 %v4595_v12  ;;  %4694 = vmatpush3.bf16.msra.mxu0 %v7068_v45 }
 0x1a4   : > { %4161 = vmatmul.mubr.f32.gmra.mrb[6].mxu1 %v6048_v59  ;;  %4404 = vmatmul.mubr.f32.gmra.mrb[8].mxu0 %v6092_v52 }
 0x1a5   : > { %4163 = vmatprep.mubr.f32.mxu1 %v6075_v19  ;;  %4406 = vmatprep.mubr.f32.mxu0 %v6106_v15 }
 0x1a6   : > { %4598 = vmatpush3.bf16.msra.mxu1 %v4595_v12  ;;  %4696 = vmatprep.subr.bf16.mxu0 %v7071_v34 }
 0x1a7   : > { %4600 = vmatprep.subr.bf16.mxu1 %v4599_v57  ;;  %4698 = vmatpush3.bf16.msra.mxu0 %v7071_v34 }
 0x1a8   : > { %4164 = vmatmul.mubr.f32.gmra.mrb[8].mxu1 %v6092_v52  ;;  %4407 = vmatmul.mubr.f32.gmra.mrb[10].mxu0 %v6138_v8 }
 0x1a9   : > { %4166 = vmatprep.mubr.f32.mxu1 %v6106_v15  ;;  %4409 = vmatprep.mubr.f32.mxu0 %v6154_v16 }
 0x1aa   : > { %4602 = vmatpush3.bf16.msra.mxu1 %v4599_v57  ;;  %4700 = vmatprep.subr.bf16.mxu0 %v7074_v2 }
 0x1ab   : > { %4604 = vmatprep.subr.bf16.mxu1 %v4603_v62  ;;  %4702 = vmatpush3.bf16.msra.mxu0 %v7074_v2 }
 0x1ac   : > { %4167 = vmatmul.mubr.f32.gmra.mrb[10].mxu1 %v6138_v8  ;;  %4410 = vmatmul.mubr.f32.gmra.mrb[12].mxu0 %v6176_v43 }
 0x1ad   : > { %4169 = vmatprep.mubr.f32.mxu1 %v6154_v16  ;;  %4412 = vmatprep.mubr.f32.mxu0 %v6179_v20 }
 0x1ae   : > { %4606 = vmatpush3.bf16.msra.mxu1 %v4603_v62  ;;  %4704 = vmatprep.subr.bf16.mxu0 %v7076_v18 }
 0x1af   : > { %4608 = vmatprep.subr.bf16.mxu1 %v4607_v41  ;;  %4706 = vmatpush3.bf16.msra.mxu0 %v7076_v18 }
 0x1b0   : > { %4170 = vmatmul.mubr.f32.gmra.mrb[12].mxu1 %v6176_v43  ;;  %4413 = vmatmul.mubr.f32.gmra.mrb[14].mxu0 %v6215_v14 }
 0x1b1   : > { %4172 = vmatprep.mubr.f32.mxu1 %v6179_v20  ;;  %4415 = vmatprep.mubr.f32.mxu0 %v6231_v35 }
 0x1b2   : > { %4610 = vmatpush3.bf16.msra.mxu1 %v4607_v41  ;;  %4708 = vmatprep.subr.bf16.mxu0 %v7077_v31 }
 0x1b3   : > { %4612 = vmatprep.subr.bf16.mxu1 %v4611_v40  ;;  %4710 = vmatpush3.bf16.msra.mxu0 %v7077_v31 }
 0x1b4   : > { %4173 = vmatmul.mubr.f32.gmra.mrb[14].mxu1 %v6215_v14  ;;  %4416 = vmatmul.mubr.f32.gmra.mrb[16].mxu0 %v6260_v22 }
 0x1b5   : > { %4175 = vmatprep.mubr.f32.mxu1 %v6231_v35  ;;  %4418 = vmatprep.mubr.f32.mxu0 %v6263_v3 }
 0x1b6   : > { %4614 = vmatpush3.bf16.msra.mxu1 %v4611_v40 }
 0x1b8   : > { %4176 = vmatmul.mubr.f32.gmra.mrb[16].mxu1 %v6260_v22  ;;  %4419 = vmatmul.mubr.f32.gmra.mrb[18].mxu0 %v6299_v9 }
 0x1b9   : > { %4178 = vmatprep.mubr.f32.mxu1 %v6263_v3  ;;  %4421 = vmatprep.mubr.f32.mxu0 %v6315_v47 }
 0x1bc   : > { %4179 = vmatmul.mubr.f32.gmra.mrb[18].mxu1 %v6299_v9  ;;  %4422 = vmatmul.mubr.f32.gmra.mrb[20].mxu0 %v6344_v30 }
 0x1bd   : > { %4181 = vmatprep.mubr.f32.mxu1 %v6315_v47  ;;  %4424 = vmatprep.mubr.f32.mxu0 %v6347_v54 }
 0x1c0   : > { %4182 = vmatmul.mubr.f32.gmra.mrb[20].mxu1 %v6344_v30  ;;  %4425 = vmatmul.mubr.f32.gmra.mrb[22].mxu0 %v6393_v48 }
 0x1c1   : > { %4184 = vmatprep.mubr.f32.mxu1 %v6347_v54  ;;  %4427 = vmatprep.mubr.f32.mxu0 %v6406_v6 }
 0x1c4   : > { %4185 = vmatmul.mubr.f32.gmra.mrb[22].mxu1 %v6393_v48  ;;  %4428 = vmatmul.mubr.f32.gmra.mrb[24].mxu0 %v6423_v55 }
 0x1c5   : > { %4187 = vmatprep.mubr.f32.mxu1 %v6406_v6  ;;  %4430 = vmatprep.mubr.f32.mxu0 %v6430_v29 }
 0x1c8   : > { %4188 = vmatmul.mubr.f32.gmra.mrb[24].mxu1 %v6423_v55  ;;  %4431 = vmatmul.mubr.f32.gmra.mrb[26].mxu0 %v6446_v49 }
 0x1c9   : > { %4190 = vmatprep.mubr.f32.mxu1 %v6430_v29  ;;  %4433 = vmatprep.mubr.f32.mxu0 %v6471_v17 }
 0x1cc   : > { %4191 = vmatmul.mubr.f32.gmra.mrb[26].mxu1 %v6446_v49  ;;  %4434 = vmatmul.mubr.f32.gmra.mrb[28].mxu0 %v6475_v26 }
 0x1cd   : > { %4193 = vmatprep.mubr.f32.mxu1 %v6471_v17  ;;  %4436 = vmatprep.mubr.f32.mxu0 %v6491_v58 }
 0x1d0   : > { %4194 = vmatmul.mubr.f32.gmra.mrb[28].mxu1 %v6475_v26  ;;  %4437 = vmatmul.mubr.f32.gmra.mrb[30].mxu0 %v6493_v38 }
 0x1d1   : > { %4196 = vmatprep.mubr.f32.mxu1 %v6491_v58  ;;  %4471 = vmatprep.mubr.f32.mxu0 %v7059_v4  ;;  %v7082_v4 = vld [vmem:[#allocation40_spill] sm:$0xff] }
 0x1d4   : > { %4197 = vmatmul.mubr.f32.gmra.mrb[30].mxu1 %v6493_v38  ;;  %4472 = vmatmul.mubr.f32.vlgmr.msra.gmra.mrb[0].mxu0 %v5899_v21  ;;  %v7083_v21 = vld [vmem:[#allocation41_spill] sm:$0xff] }
 0x1d5   : > { %4231 = vmatprep.mubr.f32.mxu1 %v7078_v56  ;;  %4474 = vmatprep.mubr.f32.mxu0 %v5924_v50  ;;  %v7084_v50 = vld [vmem:[#allocation42_spill] sm:$0xff] }
 0x1d8   : > { %4232 = vmatmul.mubr.f32.vlgmr.msra.gmra.mrb[0].mxu1 %v7079_v32  ;;  %4475 = vmatmul.mubr.f32.gmra.mrb[2].mxu0 %v5940_v61  ;;  %v7085_v61 = vld [vmem:[#allocation43_spill] sm:$0xff] }
 0x1d9   : > { %4234 = vmatprep.mubr.f32.mxu1 %v7080_v53  ;;  %4477 = vmatprep.mubr.f32.mxu0 %v5966_v28  ;;  %v7086_v28 = vld [vmem:[#allocation44_spill] sm:$0xff] }
 0x1dc   : > { %4235 = vmatmul.mubr.f32.gmra.mrb[2].mxu1 %v7081_v5  ;;  %4478 = vmatmul.mubr.f32.gmra.mrb[4].mxu0 %v6000_v13  ;;  %v7087_v13 = vld [vmem:[#allocation45_spill] sm:$0xff] }
 0x1dd   : > { %4237 = vmatprep.mubr.f32.mxu1 %v7082_v4  ;;  %4480 = vmatprep.mubr.f32.mxu0 %v6013_v63  ;;  %v7088_v63 = vld [vmem:[#allocation46_spill] sm:$0xff] }
 0x1e0   : > { %4238 = vmatmul.mubr.f32.gmra.mrb[4].mxu1 %v7083_v21  ;;  %4481 = vmatmul.mubr.f32.gmra.mrb[6].mxu0 %v6048_v59  ;;  %v7089_v59 = vld [vmem:[#allocation20_spill] sm:$0xff] }
 0x1e1   : > { %4240 = vmatprep.mubr.f32.mxu1 %v7084_v50  ;;  %4483 = vmatprep.mubr.f32.mxu0 %v6075_v19  ;;  %v7090_v19 = vld [vmem:[#allocation21_spill] sm:$0xff] }
 0x1e4   : > { %4241 = vmatmul.mubr.f32.gmra.mrb[6].mxu1 %v7085_v61  ;;  %4484 = vmatmul.mubr.f32.gmra.mrb[8].mxu0 %v6092_v52  ;;  %v7091_v52 = vld [vmem:[#allocation47_spill] sm:$0xff] }
 0x1e5   : > { %4243 = vmatprep.mubr.f32.mxu1 %v7086_v28  ;;  %4486 = vmatprep.mubr.f32.mxu0 %v6106_v15  ;;  %v7092_v15 = vld [vmem:[#allocation48_spill] sm:$0xff] }
 0x1e8   : > { %4244 = vmatmul.mubr.f32.gmra.mrb[8].mxu1 %v7087_v13  ;;  %4487 = vmatmul.mubr.f32.gmra.mrb[10].mxu0 %v6138_v8  ;;  %v7093_v8 = vld [vmem:[#allocation49_spill] sm:$0xff] }
 0x1e9   : > { %4246 = vmatprep.mubr.f32.mxu1 %v7088_v63  ;;  %4489 = vmatprep.mubr.f32.mxu0 %v6154_v16  ;;  %v7094_v16 = vld [vmem:[#allocation50_spill] sm:$0xff] }
 0x1ec   : > { %4247 = vmatmul.mubr.f32.gmra.mrb[10].mxu1 %v7089_v59  ;;  %4490 = vmatmul.mubr.f32.gmra.mrb[12].mxu0 %v6176_v43  ;;  %v7095_v43 = vld [vmem:[#allocation51_spill] sm:$0xff] }
 0x1ed   : > { %4249 = vmatprep.mubr.f32.mxu1 %v7090_v19  ;;  %4492 = vmatprep.mubr.f32.mxu0 %v6179_v20  ;;  %v7096_v20 = vld [vmem:[#allocation52_spill] sm:$0xff] }
 0x1f0   : > { %4250 = vmatmul.mubr.f32.gmra.mrb[12].mxu1 %v7091_v52  ;;  %4493 = vmatmul.mubr.f32.gmra.mrb[14].mxu0 %v6215_v14  ;;  %v7097_v14 = vld [vmem:[#allocation53_spill] sm:$0xff] }
 0x1f1   : > { %4252 = vmatprep.mubr.f32.mxu1 %v7092_v15  ;;  %4495 = vmatprep.mubr.f32.mxu0 %v6231_v35  ;;  %v7098_v35 = vld [vmem:[#allocation54_spill] sm:$0xff] }
 0x1f4   : > { %4253 = vmatmul.mubr.f32.gmra.mrb[14].mxu1 %v7093_v8  ;;  %4496 = vmatmul.mubr.f32.gmra.mrb[16].mxu0 %v6260_v22  ;;  %v7099_v22 = vld [vmem:[#allocation55_spill] sm:$0xff] }
 0x1f5   : > { %4255 = vmatprep.mubr.f32.mxu1 %v7094_v16  ;;  %4498 = vmatprep.mubr.f32.mxu0 %v6263_v3  ;;  %v7100_v3 = vld [vmem:[#allocation56_spill] sm:$0xff] }
 0x1f8   : > { %4256 = vmatmul.mubr.f32.gmra.mrb[16].mxu1 %v7095_v43  ;;  %4499 = vmatmul.mubr.f32.gmra.mrb[18].mxu0 %v6299_v9 }
 0x1f9   : > { %4258 = vmatprep.mubr.f32.mxu1 %v7096_v20  ;;  %4501 = vmatprep.mubr.f32.mxu0 %v6315_v47 }
 0x1fc   : > { %4259 = vmatmul.mubr.f32.gmra.mrb[18].mxu1 %v7097_v14  ;;  %4502 = vmatmul.mubr.f32.gmra.mrb[20].mxu0 %v6344_v30  ;;  %v6666_v30 = vld [vmem:[%s6873_s6] ss:$0 sm:$0xff] }
 0x1fd   : > { %4261 = vmatprep.mubr.f32.mxu1 %v7098_v35  ;;  %4504 = vmatprep.mubr.f32.mxu0 %v6347_v54 }
 0x200   : > { %4262 = vmatmul.mubr.f32.gmra.mrb[20].mxu1 %v7099_v22  ;;  %4505 = vmatmul.mubr.f32.gmra.mrb[22].mxu0 %v6393_v48 }
 0x201   : > { %4264 = vmatprep.mubr.f32.mxu1 %v7100_v3  ;;  %4507 = vmatprep.mubr.f32.mxu0 %v6406_v6 }
 0x204   : > { %4265 = vmatmul.mubr.f32.gmra.mrb[22].mxu1 %v6403_v33  ;;  %4508 = vmatmul.mubr.f32.gmra.mrb[24].mxu0 %v6423_v55 }
 0x205   : > { %4267 = vmatprep.mubr.f32.mxu1 %v6418_v24  ;;  %4510 = vmatprep.mubr.f32.mxu0 %v6430_v29 }
 0x208   : > { %4268 = vmatmul.mubr.f32.gmra.mrb[24].mxu1 %v6434_v36  ;;  %4511 = vmatmul.mubr.f32.gmra.mrb[26].mxu0 %v6446_v49 }
 0x209   : > { %4270 = vmatprep.mubr.f32.mxu1 %v6444_v10  ;;  %4513 = vmatprep.mubr.f32.mxu0 %v6471_v17 }
 0x20c   : > { %4271 = vmatmul.mubr.f32.gmra.mrb[26].mxu1 %v6457_v46  ;;  %4514 = vmatmul.mubr.f32.gmra.mrb[28].mxu0 %v6475_v26 }
 0x20d   : > { %4273 = vmatprep.mubr.f32.mxu1 %v6478_v23  ;;  %4516 = vmatprep.mubr.f32.mxu0 %v6491_v58 }
 0x210   : > { %4274 = vmatmul.mubr.f32.gmra.mrb[28].mxu1 %v6481_v51  ;;  %4517 = vmatmul.mubr.f32.gmra.mrb[30].mxu0 %v6493_v38 }
 0x211   : > { %4276 = vmatprep.mubr.f32.mxu1 %v6496_v27 }
 0x214   : > { %4277 = vmatmul.mubr.f32.gmra.mrb[30].mxu1 %v6499_v39 }
 0x2a7   : > { %v4473_v9 = vpop.f32.mrb[0].mxu0 }
 0x2a8   : > { %v2820_v47 = vpop.f32.mrb[1].mxu0 }
 0x2ab   : > { %v4233_v54 = vpop.f32.mrb[0].mxu1  ;;  %v4476_v48 = vpop.f32.mrb[2].mxu0 }
 0x2ac   : > { %v4711_v33 = vadd.f32 %v4233_v54, %v6666_v30  ;;  %v1874_v6 = vpop.f32.mrb[1].mxu1  ;;  %v2832_v24 = vpop.f32.mrb[3].mxu0 }
 0x2ad   : > { %v4713_v55 = vadd.f32 %v6666_v30, %v1874_v6 }
 0x2ae   : > { %v4712_v29 = vadd.f32 %v4711_v33, %v4473_v9 }
 0x2af   : > { %v4236_v36 = vpop.f32.mrb[2].mxu1  ;;  %v4479_v10 = vpop.f32.mrb[4].mxu0  ;;  %v4714_v49 = vadd.f32 %v4713_v55, %v2820_v47 }
 0x2b0   : > { %v4715_v46 = vadd.f32 %v4236_v36, %v6666_v30  ;;  %v1888_v17 = vpop.f32.mrb[3].mxu1  ;;  %v2844_v26 = vpop.f32.mrb[5].mxu0 }
 0x2b1   : > { %v4717_v23 = vadd.f32 %v6666_v30, %v1888_v17  ;;  %3010 = vxpose.xlu0.b32.start [1/16] (narrow) %v4714_v49, 8 }
 0x2b2   : > { %v4716_v51 = vadd.f32 %v4715_v46, %v4476_v48 }
 0x2b3   : > { %v4718_v58 = vadd.f32 %v4717_v23, %v2832_v24  ;;  %v4239_v38 = vpop.f32.mrb[4].mxu1  ;;  %v4482_v27 = vpop.f32.mrb[6].mxu0 }
 0x2b4   : > { %v4719_v39 = vadd.f32 %v4239_v38, %v6666_v30  ;;  %v1902_v25 = vpop.f32.mrb[5].mxu1  ;;  %v2856_v42 = vpop.f32.mrb[7].mxu0 }
 0x2b5   : > { %v4721_v1 = vadd.f32 %v6666_v30, %v1902_v25  ;;  %3011 = vxpose.xlu0.b32.cont [2/16] (narrow) %v4712_v29, 8 }
 0x2b6   : > { %v4720_v11 = vadd.f32 %v4719_v39, %v4479_v10 }
 0x2b7   : > { %v4722_v12 = vadd.f32 %v4721_v1, %v2844_v26  ;;  %v4242_v45 = vpop.f32.mrb[6].mxu1  ;;  %v4485_v0 = vpop.f32.mrb[8].mxu0 }
 0x2b8   : > { %v4723_v7 = vadd.f32 %v4242_v45, %v6666_v30  ;;  %v1916_v57 = vpop.f32.mrb[7].mxu1  ;;  %v2868_v34 = vpop.f32.mrb[9].mxu0 }
 0x2b9   : > { %v4725_v44 = vadd.f32 %v6666_v30, %v1916_v57  ;;  %3012 = vxpose.xlu0.b32.cont [3/16] (narrow) %v4718_v58, 8 }
 0x2ba   : > { %v4724_v60 = vadd.f32 %v4723_v7, %v4482_v27 }
 0x2bb   : > { %v4726_v62 = vadd.f32 %v4725_v44, %v2856_v42  ;;  %v4245_v2 = vpop.f32.mrb[8].mxu1  ;;  %v4488_v37 = vpop.f32.mrb[10].mxu0 }
 0x2bc   : > { %v4727_v41 = vadd.f32 %v4245_v2, %v6666_v30  ;;  %v1930_v18 = vpop.f32.mrb[9].mxu1  ;;  %v2880_v40 = vpop.f32.mrb[11].mxu0 }
 0x2bd   : > { %v4729_v31 = vadd.f32 %v6666_v30, %v1930_v18  ;;  %3013 = vxpose.xlu0.b32.cont [4/16] (narrow) %v4716_v51, 8 }
 0x2be   : > { %v4728_v56 = vadd.f32 %v4727_v41, %v4485_v0 }
 0x2bf   : > { %v4730_v32 = vadd.f32 %v4729_v31, %v2868_v34  ;;  %v4248_v53 = vpop.f32.mrb[10].mxu1  ;;  %v4491_v5 = vpop.f32.mrb[12].mxu0 }
 0x2c0   : > { %v4731_v4 = vadd.f32 %v4248_v53, %v6666_v30  ;;  %v1944_v21 = vpop.f32.mrb[11].mxu1  ;;  %v2892_v50 = vpop.f32.mrb[13].mxu0 }
 0x2c1   : > { %v4733_v61 = vadd.f32 %v6666_v30, %v1944_v21  ;;  %3014 = vxpose.xlu0.b32.cont [5/16] (narrow) %v4722_v12, 8 }
 0x2c2   : > { %v6680_v28 = vadd.f32 %v4731_v4, %v4488_v37 }
 0x2c3   : > { %v4734_v13 = vadd.f32 %v4733_v61, %v2880_v40  ;;  %v4251_v63 = vpop.f32.mrb[12].mxu1  ;;  %v4494_v59 = vpop.f32.mrb[14].mxu0 }
 0x2c4   : > { %v4735_v19 = vadd.f32 %v4251_v63, %v6666_v30  ;;  %v1958_v52 = vpop.f32.mrb[13].mxu1  ;;  %v2904_v15 = vpop.f32.mrb[15].mxu0 }
 0x2c5   : > { %v4737_v8 = vadd.f32 %v6666_v30, %v1958_v52  ;;  %3015 = vxpose.xlu0.b32.cont [6/16] (narrow) %v4720_v11, 8 }
 0x2c6   : > { %v6684_v16 = vadd.f32 %v4735_v19, %v4491_v5 }
 0x2c7   : > { %v6686_v43 = vadd.f32 %v4737_v8, %v2892_v50  ;;  %v4254_v20 = vpop.f32.mrb[14].mxu1  ;;  %v4497_v14 = vpop.f32.mrb[16].mxu0 }
 0x2c8   : > { %v4739_v35 = vadd.f32 %v4254_v20, %v6666_v30  ;;  %v1972_v22 = vpop.f32.mrb[15].mxu1  ;;  %v2916_v3 = vpop.f32.mrb[17].mxu0 }
 0x2c9   : > { %v4741_v9 = vadd.f32 %v6666_v30, %v1972_v22  ;;  %3016 = vxpose.xlu0.b32.cont [7/16] (narrow) %v4726_v62, 8 }
 0x2ca   : > { %v6690_v47 = vadd.f32 %v4739_v35, %v4494_v59 }
 0x2cb   : > { %v6692_v54 = vadd.f32 %v4741_v9, %v2904_v15  ;;  %v4257_v48 = vpop.f32.mrb[16].mxu1  ;;  %v4500_v33 = vpop.f32.mrb[18].mxu0 }
 0x2cc   : > { %v4743_v6 = vadd.f32 %v4257_v48, %v6666_v30  ;;  %v1986_v24 = vpop.f32.mrb[17].mxu1  ;;  %v2928_v55 = vpop.f32.mrb[19].mxu0 }
 0x2cd   : > { %v4745_v29 = vadd.f32 %v6666_v30, %v1986_v24  ;;  %3017 = vxpose.xlu0.b32.cont [8/16] (narrow) %v4724_v60, 8 }
 0x2ce   : > { %v4744_v36 = vadd.f32 %v4743_v6, %v4497_v14 }
 0x2cf   : > { %v4260_v10 = vpop.f32.mrb[18].mxu1  ;;  %v4503_v49 = vpop.f32.mrb[20].mxu0  ;;  %v4746_v46 = vadd.f32 %v4745_v29, %v2916_v3 }
 0x2d0   : > { %v4747_v17 = vadd.f32 %v4260_v10, %v6666_v30  ;;  %v2000_v26 = vpop.f32.mrb[19].mxu1  ;;  %v2940_v23 = vpop.f32.mrb[21].mxu0 }
 0x2d1   : > { %v4749_v51 = vadd.f32 %v6666_v30, %v2000_v26  ;;  %3018 = vxpose.xlu0.b32.cont [9/16] (narrow) %v4730_v32, 8  ;;  %3042 = vxpose.xlu1.b32.start [1/16] (narrow) %v4746_v46, 8 }
 0x2d2   : > { %v4748_v58 = vadd.f32 %v4747_v17, %v4500_v33 }
 0x2d3   : > { %v4750_v38 = vadd.f32 %v4749_v51, %v2928_v55  ;;  %v4263_v27 = vpop.f32.mrb[20].mxu1  ;;  %v4506_v39 = vpop.f32.mrb[22].mxu0 }
 0x2d4   : > { %v4751_v25 = vadd.f32 %v4263_v27, %v6666_v30  ;;  %v2014_v42 = vpop.f32.mrb[21].mxu1  ;;  %v2952_v1 = vpop.f32.mrb[23].mxu0 }
 0x2d5   : > { %v4753_v11 = vadd.f32 %v6666_v30, %v2014_v42  ;;  %3019 = vxpose.xlu0.b32.cont [10/16] (narrow) %v4728_v56, 8  ;;  %3043 = vxpose.xlu1.b32.cont [2/16] (narrow) %v4744_v36, 8 }
 0x2d6   : > { %v4752_v12 = vadd.f32 %v4751_v25, %v4503_v49 }
 0x2d7   : > { %v4754_v45 = vadd.f32 %v4753_v11, %v2940_v23  ;;  %v4266_v0 = vpop.f32.mrb[22].mxu1  ;;  %v4509_v7 = vpop.f32.mrb[24].mxu0 }
 0x2d8   : > { %v4755_v57 = vadd.f32 %v4266_v0, %v6666_v30  ;;  %v2028_v34 = vpop.f32.mrb[23].mxu1  ;;  %v2964_v44 = vpop.f32.mrb[25].mxu0 }
 0x2d9   : > { %v4757_v60 = vadd.f32 %v6666_v30, %v2028_v34  ;;  %3020 = vxpose.xlu0.b32.cont [11/16] (narrow) %v4734_v13, 8  ;;  %3044 = vxpose.xlu1.b32.cont [3/16] (narrow) %v4750_v38, 8 }
 0x2da   : > { %v4756_v62 = vadd.f32 %v4755_v57, %v4506_v39 }
 0x2db   : > { %v4758_v2 = vadd.f32 %v4757_v60, %v2952_v1  ;;  %v4269_v37 = vpop.f32.mrb[24].mxu1  ;;  %v4512_v41 = vpop.f32.mrb[26].mxu0 }
 0x2dc   : > { %v4759_v18 = vadd.f32 %v4269_v37, %v6666_v30  ;;  %v2042_v40 = vpop.f32.mrb[25].mxu1  ;;  %v2976_v31 = vpop.f32.mrb[27].mxu0 }
 0x2dd   : > { %v4761_v56 = vadd.f32 %v6666_v30, %v2042_v40  ;;  %3021 = vxpose.xlu0.b32.cont [12/16] (narrow) %v6680_v28, 8  ;;  %3045 = vxpose.xlu1.b32.cont [4/16] (narrow) %v4748_v58, 8 }
 0x2de   : > { %v4760_v32 = vadd.f32 %v4759_v18, %v4509_v7 }
 0x2df   : > { %v4762_v53 = vadd.f32 %v4761_v56, %v2964_v44  ;;  %v4272_v5 = vpop.f32.mrb[26].mxu1  ;;  %v4515_v4 = vpop.f32.mrb[28].mxu0 }
 0x2e0   : > { %v4763_v21 = vadd.f32 %v4272_v5, %v6666_v30  ;;  %v2056_v50 = vpop.f32.mrb[27].mxu1  ;;  %v2988_v61 = vpop.f32.mrb[29].mxu0 }
 0x2e1   : > { %v4765_v13 = vadd.f32 %v6666_v30, %v2056_v50  ;;  %3022 = vxpose.xlu0.b32.cont [13/16] (narrow) %v6686_v43, 8  ;;  %3046 = vxpose.xlu1.b32.cont [5/16] (narrow) %v4754_v45, 8  ;;  %v3248_v50 = vlaneseq }
 0x2e2   : > { %v4764_v63 = vadd.f32 %v4763_v21, %v4512_v41 }
 0x2e3   : > { %v4766_v59 = vadd.f32 %v4765_v13, %v2976_v31  ;;  %v4275_v19 = vpop.f32.mrb[28].mxu1  ;;  %v4518_v52 = vpop.f32.mrb[30].mxu0  ;;  %vm6762_vm0 = vcmp.lt.s32.totalorder %v3248_v50, 256 }
 0x2e4   : > { %v4767_v28 = vadd.f32 %v4275_v19, %v6666_v30  ;;  %v2070_v15 = vpop.f32.mrb[29].mxu1  ;;  %v3000_v8 = vpop.f32.mrb[31].mxu0 }
 0x2e5   : > { %v4769_v20 = vadd.f32 %v6666_v30, %v2070_v15  ;;  %3023 = vxpose.xlu0.b32.cont [14/16] (narrow) %v6684_v16, 8  ;;  %3047 = vxpose.xlu1.b32.cont [6/16] (narrow) %v4752_v12, 8 }
 0x2e6   : > { %v4768_v14 = vadd.f32 %v4767_v28, %v4515_v4 }
 0x2e7   : > { %v4770_v35 = vadd.f32 %v4769_v20, %v2988_v61  ;;  %v4278_v22 = vpop.f32.mrb[30].mxu1 }
 0x2e8   : > { %v4771_v3 = vadd.f32 %v4278_v22, %v6666_v30  ;;  %v2084_v43 = vpop.f32.mrb[31].mxu1 }
 0x2e9   : > { %v4773_v9 = vadd.f32 %v6666_v30, %v2084_v43  ;;  %3024 = vxpose.xlu0.b32.cont [15/16] (narrow) %v6692_v54, 8  ;;  %3048 = vxpose.xlu1.b32.cont [7/16] (narrow) %v4758_v2, 8  ;;  %v6723_v30 = vld [vmem:[%s432_s13] sm:$0xff]  ;;  %s6816_s13 = scalar_lea.hbm %s6874_s7, %s3750_s19 }
 0x2ea   : > { %v4772_v48 = vadd.f32 %v4771_v3, %v4518_v52  ;;  %v3111_v16 = vmul.f32 %v6723_v30, %v6723_v30  ;;  %v3134_v36 = vrot.slane %v6723_v30, 5  ;;  %v3150_v49 = vrot.slane %v6723_v30, 6 }
 0x2eb   : > { %v4774_v33 = vadd.f32 %v4773_v9, %v3000_v8  ;;  %v3179_v26 = vrot.slane %v6723_v30, 7 }
 0x2ec   : > { %v3117_v54 = vrot.slane %v3111_v16, 6  ;;  %v3709_v29 = vrot.slane %v3111_v16, 11  ;;  %v3139_v46 = vmul.f32 %v3134_v36, %v6723_v30  ;;  %v3155_v17 = vmul.f32 %v3150_v49, %v6723_v30 }
 0x2ed   : > { %3025 = vxpose.xlu0.b32.end [16/16] (narrow) %v6690_v47, 8  ;;  %3049 = vxpose.xlu1.b32.cont [8/16] (narrow) %v4756_v62, 8  ;;  %v3708_v47 = vrot.slane %v3111_v16, 9  ;;  %v3135_v23 = vrot.slane %v3134_v36, 4  ;;  %v3151_v38 = vrot.slane %v3150_v49, 4  ;;  %v3181_v39 = vmul.f32 %v3179_v26, %v6723_v30 }
 0x2ee   : > { %v3118_v24 = vrot.slane %v3117_v54, 4  ;;  %v3141_v51 = vrot.slane %v3139_v46, 6  ;;  %v3157_v27 = vrot.slane %v3155_v17, 5 }
 0x2ef   : > { %v3116_v6 = vadd.f32 %v3708_v47, %v3111_v16  ;;  %v3137_v42 = vmul.f32 %v3135_v23, %v6723_v30  ;;  %v3153_v11 = vmul.f32 %v3151_v38, %v6723_v30  ;;  %v3183_v0 = vrot.slane %v3181_v39, 7 }
 0x2f0   : > { %v3142_v1 = vrot.slane %v3141_v51, 4  ;;  %v3158_v12 = vrot.slane %v3157_v27, 4  ;;  %v3172_v45 = vadd.f32 %v3118_v24, %v3111_v16 }
 0x2f1   : > { %3050 = vxpose.xlu1.b32.cont [9/16] (narrow) %v4762_v53, 8  ;;  %v3120_v55 = vadd.f32 %v3118_v24, %v3116_v6  ;;  %v3710_v60 = vrot.slane %v3116_v6, 10  ;;  %v3197_v18 = vadd.f32 %v3183_v0, %v3137_v42  ;;  %v3185_v40 = vsub.f32 %v3137_v42, %v3183_v0 }
 0x2f2   : > { %v3144_v44 = vsub.f32 %v3137_v42, %v3142_v1  ;;  %v3160_v62 = vadd.f32 %v3158_v12, %v3153_v11  ;;  %v3166_v37 = vadd.f32 %v3142_v1, %v3137_v42  ;;  %v3714_v41 = vrot.slane %v3172_v45, 9 }
 0x2f3   : > { %v3124_v10 = vadd.f32 %v3709_v29, %v3120_v55  ;;  %v3191_v31 = vsub.f32 %v3153_v11, %v3158_v12  ;;  %v3718_v56 = vrot.slane %v3116_v6, 9  ;;  %v3717_v19 = vrot.slane %v3197_v18, 10  ;;  %v3400_v6 = vld [vmem:[%s442_s17] sm:$0x77]  ;;  %s5125_s17 = sshll.u32 %s5214_s16, 4  ;;  %s5126_s17 = int_to_ptr.vmem [resolvable:$false] %s5125_s17 }
 0x2f4   : > { %v3711_v21 = vrot.slane %v3144_v44, 9  ;;  %v3712_v61 = vrot.slane %v3160_v62, 9  ;;  %v3715_v52 = vrot.slane %v3185_v40, 10  ;;  %v3737_v17 = vrot.slane %v3400_v6, 9  ;;  %s5127_s12 = scalar_lea.vmem %s5126_s17, 256  ;;  %p5128_p11 = scmp.lt.s32.totalorder %s6818_s23, %s5126_s17 }
 0x2f5   : > { %3051 = vxpose.xlu1.b32.cont [10/16] (narrow) %v4760_v32, 8  ;;  %5043 = vrcp.f32 %v3124_v10  ;;  %v5213_v32 = vmov 1966171168   ;;  %v3716_v28 = vrot.slane %v3191_v31, 9  ;;  %v3739_v45 = vrot.slane %v3400_v6, 10  ;;  %p5129_p0 = scmp.lt.s32.totalorder %s5127_s12, %s5121_s15 }
 0x2f6   : > { %v3246_v53 = vunpack.c.l.s4 %v5213_v32 }
 0x2f7   : > { %p5130_p5 = por %p5129_p0, %p5128_p11 }
 0x2f8   : > { %v3247_v15 = vunpack.c.0.s8 %v3246_v53 }
 0x2f9   : > { %3052 = vxpose.xlu1.b32.cont [11/16] (narrow) %v4766_v59, 8  ;;  %p5131_p9 = pnand %p5130_p5, %p5124_p12 }
 0x2fd   : > { %3053 = vxpose.xlu1.b32.cont [12/16] (narrow) %v4764_v63, 8  ;;  %v3713_v63 = vrot.slane %v3166_v37, 9 }
 0x2ff   : > { %v5044_v7 = vpop.eup %5043 }
 0x300   : > { %v3126_v2 = vmul.f32 2.0, %v5044_v7 }
 0x301   : > { %3054 = vxpose.xlu1.b32.cont [13/16] (narrow) %v4770_v35, 8  ;;  %v3249_v35 = vshrl.u32 %v3248_v50, 7 }
 0x302   : > { %v3131_v13 = vmul.f32 %v3710_v60, %v3126_v2  ;;  %v3177_v59 = vmul.f32 %v3714_v41, %v3126_v2  ;;  %v3149_v20 = vmul.f32 %v3711_v21, %v3126_v2  ;;  %v3165_v3 = vmul.f32 %v3712_v61, %v3126_v2 }
 0x303   : > { %v3171_v16 = vmul.f32 %v3713_v63, %v3126_v2  ;;  %v3202_v54 = vmul.f32 %v3717_v19, %v3126_v2  ;;  %v3196_v24 = vmul.f32 %v3716_v28, %v3126_v2  ;;  %v3190_v10 = vmul.f32 %v3715_v52, %v3126_v2 }
 0x304   : > { %v3178_v47 = vsub.f32 1.0, %v3177_v59  ;;  %v6752_v62 = vsub.s32 %v3247_v15, %v3249_v35 }
 0x305   : > { %3055 = vxpose.xlu1.b32.cont [14/16] (narrow) %v4768_v14, 8  ;;  %v3206_v14 = vmul.f32 %v3718_v56, %v3126_v2 }
 0x307   : > { %v3207_v49 = vsub.f32 1.0, %v3206_v14 }
 0x309   : > { %3056 = vxpose.xlu1.b32.cont [15/16] (narrow) %v4774_v33, 8  ;;  %v3132_v33 = vsub.f32 1.0, %v3131_v13 }
 0x30d   : > { %3057 = vxpose.xlu1.b32.end [16/16] (narrow) %v4772_v48, 8 }
 0x331   : > { %v6732_v58 = vpop.trf.xlu0 }
 0x332   : > { %v3074_v25 = vmul.f32 %v6732_v58, %v6732_v58 }
 0x334   : > { %v3076_v57 = vadd.f32 1.0, %v3074_v25  ;;  %v3080_v34 = vrot.slane %v3074_v25, 1  ;;  %v3086_v4 = vrot.slane %v3074_v25, 2 }
 0x336   : > { %v3084_v5 = vadd.f32 %v3080_v34, %v3076_v57 }
 0x338   : > { %v3090_v8 = vadd.f32 %v3086_v4, %v3084_v5 }
 0x33a   : > { %5045 = vrsqrt.f32 %v3090_v8 }
 0x344   : > { %v5046_v56 = vpop.eup %5045 }
 0x345   : > { %v3098_v21 = vrot.slane %v5046_v56, 7  ;;  %v3104_v59 = vrot.slane %v5046_v56, 6  ;;  %v3094_v52 = vmul.f32 %v5046_v56, %v6732_v58 }
 0x347   : > { %v3108_v14 = vmul.f32 %v3104_v59, %v6732_v58 }
 0x351   : > { %v6744_v22 = vpop.trf.xlu1 }
 0x352   : > { %v3075_v43 = vmul.f32 %v6744_v22, %v6744_v22  ;;  %v3403_v9 = vcombine.low %v6732_v58, %v6744_v22  ;;  %v3408_v48 = vcombine.high %v6732_v58, %v6744_v22 }
 0x354   : > { %v3077_v55 = vadd.f32 1.0, %v3075_v43  ;;  %v3081_v29 = vrot.slane %v3075_v43, 1  ;;  %v3404_v36 = vrot.slane %v3403_v9, 7  ;;  %v3412_v46 = vrot.slane %v3408_v48, 5 }
 0x355   : > { %v3087_v23 = vrot.slane %v3075_v43, 2  ;;  %v3410_v38 = vmul.f32 %v3408_v48, %v3149_v20  ;;  %v3436_v39 = vmul.f32 %v3408_v48, %v3178_v47  ;;  %v3464_v25 = vmul.f32 %v3408_v48, %v3202_v54 }
 0x356   : > { %v3085_v26 = vadd.f32 %v3081_v29, %v3077_v55  ;;  %v3405_v51 = vrot.slane %v3404_v36, 4  ;;  %v3413_v27 = vrot.slane %v3412_v46, 4  ;;  %v3102_v20 = vmul.f32 %v3098_v21, %v6732_v58 }
 0x358   : > { %v3091_v42 = vadd.f32 %v3087_v23, %v3085_v26  ;;  %v3407_v1 = vmul.f32 %v3405_v51, %v3132_v33  ;;  %v3435_v11 = vmul.f32 %v3405_v51, %v3171_v16  ;;  %v3463_v12 = vmul.f32 %v3405_v51, %v3196_v24 }
 0x359   : > { %v3415_v0 = vmul.f32 %v3413_v27, %v3165_v3  ;;  %v3438_v7 = vmul.f32 %v3413_v27, %v3190_v10  ;;  %v3466_v57 = vmul.f32 %v3413_v27, %v3207_v49 }
 0x35a   : > { %5047 = vrsqrt.f32 %v3091_v42  ;;  %v3411_v34 = vadd.f32 %v3410_v38, %v3407_v1  ;;  %v3437_v44 = vadd.f32 %v3436_v39, %v3435_v11  ;;  %v3465_v60 = vadd.f32 %v3464_v25, %v3463_v12 }
 0x35c   : > { %v3416_v2 = vadd.f32 %v3415_v0, %v3411_v34  ;;  %v3439_v37 = vadd.f32 %v3438_v7, %v3437_v44  ;;  %v3467_v41 = vadd.f32 %v3466_v57, %v3465_v60 }
 0x35e   : > { %v3417_v18 = vadd.f32 %v3416_v2, %v3400_v6  ;;  %v3444_v40 = vadd.f32 %v3737_v17, %v3439_v37  ;;  %v3471_v31 = vadd.f32 %v3739_v45, %v3467_v41 }
 0x360   : > { %v3425_v32 = vrot.slane %v3417_v18, %v6752_v62  ;;  %v3452_v53 = vrot.slane %v3444_v40, %v6752_v62  ;;  %v3479_v5 = vrot.slane %v3471_v31, %v6752_v62 }
 0x362   : > { %v3432_v61 = vrot.slane %v3425_v32, %v6752_v62  ;;  %v3459_v13 = vrot.slane %v3452_v53, %v6752_v62  ;;  %v3486_v63 = vrot.slane %v3479_v5, %v6752_v62 }
 0x364   : > { %v5048_v19 = vpop.eup %5047  ;;  %3434 = vst.msk [vmem:[%s453_s25] ss:$4 sm:$0x3] %vm6762_vm0, %v3432_v61  ;;  %3738 = vst.msk [vmem:[%s453_s25 + $0x1] ss:$4 sm:$0x3] %vm6762_vm0, %v3459_v13 }
 0x365   : > { %3740 = vst.msk [vmem:[%s453_s25 + $0x2] ss:$4 sm:$0x3] %vm6762_vm0, %v3486_v63  ;;  %v3095_v50 = vmul.f32 %v5048_v19, %v6744_v22  ;;  %v3099_v28 = vrot.slane %v5048_v19, 7  ;;  %v3105_v15 = vrot.slane %v5048_v19, 6  ;;  %v3208_v8 = vcombine.low %v5046_v56, %v5048_v19 }
 0x367   : > { %v3103_v35 = vmul.f32 %v3099_v28, %v6744_v22  ;;  %v3109_v3 = vmul.f32 %v3105_v15, %v6744_v22  ;;  %v3213_v43 = vcombine.low %v3094_v52, %v3095_v50  ;;  %v3210_v9 = vmul.f32 %v3208_v8, %v6723_v30 }
 0x368   : > { %v3267_v48 = vrot.slane %v3208_v8, 7  ;;  %v3321_v33 = vrot.slane %v3208_v8, 6  ;;  %v3374_v6 = vrot.slane %v3208_v8, 5 }
 0x369   : > { %v3214_v16 = vrot.slane %v3213_v43, 7  ;;  %v3224_v47 = vcombine.low %v3102_v20, %v3103_v35  ;;  %v3235_v54 = vcombine.low %v3108_v14, %v3109_v3  ;;  %v3266_v24 = vmul.f32 %v3213_v43, %v6723_v30 }
 0x36a   : > { %v3269_v55 = vmul.f32 %v3267_v48, %v6723_v30  ;;  %v3329_v29 = vrot.slane %v3213_v43, 5  ;;  %v3366_v36 = vrot.slane %v3213_v43, 6  ;;  %v3323_v11 = vmul.f32 %v3321_v33, %v6723_v30 }
 0x36b   : > { %v3216_v58 = vmul.f32 %v3214_v16, %v6723_v30  ;;  %v3225_v10 = vrot.slane %v3224_v47, 7  ;;  %v3236_v49 = vrot.slane %v3235_v54, 7  ;;  %v3276_v22 = vmul.f32 %v3235_v54, %v6723_v30 }
 0x36c   : > { %v3722_v46 = vrot.slane %v3269_v55, 9  ;;  %v3282_v17 = vrot.slane %v3224_v47, 6  ;;  %v3726_v26 = vrot.slane %v3224_v47, 9  ;;  %v3727_v23 = vrot.slane %v3235_v54, 9 }
 0x36d   : > { %v3719_v51 = vrot.slane %v3216_v58, 9  ;;  %v3227_v38 = vmul.f32 %v3225_v10, %v6723_v30  ;;  %v3238_v27 = vmul.f32 %v3236_v49, %v6723_v30  ;;  %v3723_v39 = vrot.slane %v3276_v22, 10 }
 0x36e   : > { %v3274_v25 = vadd.f32 %v3722_v46, %v3266_v24  ;;  %v3284_v42 = vmul.f32 %v3282_v17, %v6723_v30  ;;  %v3315_v1 = vmul.f32 %v3727_v23, %v6723_v30  ;;  %v3311_v7 = vmul.f32 %v3726_v26, %v6723_v30 }
 0x36f   : > { %v3221_v12 = vsub.f32 %v3210_v9, %v3719_v51  ;;  %v3720_v45 = vrot.slane %v3227_v38, 10  ;;  %v3721_v0 = vrot.slane %v3238_v27, 11  ;;  %v3331_v60 = vmul.f32 %v3329_v29, %v6723_v30 }
 0x370   : > { %v3281_v57 = vadd.f32 %v3723_v39, %v3274_v25  ;;  %v3724_v34 = vrot.slane %v3284_v42, 11  ;;  %v3728_v44 = vrot.slane %v3315_v1, 9  ;;  %v3732_v37 = vrot.slane %v3235_v54, 10 }
 0x371   : > { %v3232_v2 = vsub.f32 %v3221_v12, %v3720_v45  ;;  %v3360_v41 = vmul.f32 %v3224_v47, %v6723_v30  ;;  %v3368_v18 = vmul.f32 %v3366_v36, %v6723_v30  ;;  %v3729_v56 = vrot.slane %v3323_v11, 10 }
 0x372   : > { %v3289_v40 = vsub.f32 %v3281_v57, %v3724_v34  ;;  %v3320_v31 = vsub.f32 %v3311_v7, %v3728_v44  ;;  %v3358_v53 = vmul.f32 %v3732_v37, %v6723_v30  ;;  %v3376_v21 = vmul.f32 %v3374_v6, %v6723_v30 }
 0x373   : > { %v3243_v32 = vsub.f32 %v3232_v2, %v3721_v0  ;;  %v3733_v5 = vrot.slane %v3360_v41, 9  ;;  %v3730_v63 = vrot.slane %v3331_v60, 11  ;;  %v3734_v52 = vrot.slane %v3368_v18, 10 }
 0x374   : > { %v3297_v61 = vrot.slane %v3289_v40, %v6752_v62  ;;  %v3328_v13 = vadd.f32 %v3729_v56, %v3320_v31  ;;  %v3735_v8 = vrot.slane %v3376_v21, 11 }
 0x375   : > { %v3251_v59 = vrot.slane %v3243_v32, %v6752_v62  ;;  %v3365_v19 = vadd.f32 %v3733_v5, %v3358_v53 }
 0x376   : > { %v3336_v50 = vadd.f32 %v3730_v63, %v3328_v13  ;;  %v3304_v28 = vrot.slane %v3297_v61, %v6752_v62 }
 0x377   : > { %v3373_v15 = vsub.f32 %v3365_v19, %v3734_v52  ;;  %v3258_v20 = vrot.slane %v3251_v59, %v6752_v62 }
 0x378   : > { %v3344_v14 = vrot.slane %v3336_v50, %v6752_v62  ;;  %3725 = vst.msk [vmem:[%s411_s11 + $0x1] ss:$4 sm:$0x3] %vm6762_vm0, %v3304_v28 }
 0x379   : > { %v3381_v30 = vadd.f32 %v3735_v8, %v3373_v15  ;;  %3264 = vst.msk [vmem:[%s411_s11] ss:$4 sm:$0x3] %vm6762_vm0, %v3258_v20 }
 0x37a   : > { %v3351_v35 = vrot.slane %v3344_v14, %v6752_v62 }
 0x37b   : > { %v3389_v3 = vrot.slane %v3381_v30, %v6752_v62 }
 0x37c   : > { %3731 = vst.msk [vmem:[%s411_s11 + $0x2] ss:$4 sm:$0x3] %vm6762_vm0, %v3351_v35 }
 0x37d   : > { %v3396_v43 = vrot.slane %v3389_v3, %v6752_v62 }
 0x37f   : > { %3736 = vst.msk [vmem:[%s411_s11 + $0x3] ss:$4 sm:$0x3] %vm6762_vm0, %v3396_v43 }
 0x380   : > { %5134 = shalt.err (!%p5131_p9)
}
 0x381   : > { %s5135_s14 = scalar_lea.hbm %s6816_s13, 128  ;;  %s5139_s22 = scalar_lea.hbm %s6874_s7, 256 }
 0x382   : > { %p5136_p1 = scmp.ne.s32.totalorder %s6816_s13, %s5135_s14  ;;  %p5140_p7 = scmp.lt.u32.totalorder %s6816_s13, %s6874_s7 }
 0x383   : > { %p5141_p13 = scmp.lt.u32.totalorder %s5139_s22, %s5135_s14  ;;  %p5143_p6 = scmp.lt.u32.totalorder %s5135_s14, %s6816_s13 }
 0x384   : > { %p5137_p2 = pnand %p5136_p1, %p5359_p10 }
 0x385   : > { %p5142_p4 = por %p5141_p13, %p5140_p7 }
 0x386   : > { %p5138_p3 = pneg %p5137_p2 }
 0x387   : > { %p5144_p8 = por %p5143_p6, %p5142_p4 }
 0x389   : > { %p5145_p12 = pnand %p5144_p8, %p5138_p3 }
 0x38b   : > { %5148 = shalt.err (!%p5145_p12)
}
 0x38c   : > { %4909 = dma.vmem_to_hbm [thread:$0]  (%p5359_p10), %s6818_s23, 128, %s6816_s13, %s3491_s30  }
 0x38d PF: > { %s7103_s18 = sld [smem:[#allocation11_spill]]  ;;  %s3532_s5 = sand.u32 1, %s5187_s27  }
 0x38e   : > { %p7105_p0 = scmp.ge.s32.totalorder %s5207_s10, 2  ;;  %s3533_s15 = scalar_lea.sflag [#allocation4], %s3532_s5 }
 0x393   : > { %p7104_p11 = scmp.ne.s32.totalorder %s7103_s18, 0 }
 0x395   : > { %p4920_p5 = pnand %p7105_p0, %p7104_p11 }
 0x397   : > { %5182 = dma.done.wait (!%p4920_p5), %s3533_s15, 128  }
 0x398   : > { %5184 = vsyncadd (!%p4920_p5), %s3533_s15, 4294967168  ;;  %s26_s10 = sadd.s32 1, %s5207_s10   ;;  %s7106_s27 = smov %s5191_s28 }
 0x399   : > { %p23_p9 = scmp.ge.s32.totalorder %s26_s10, 4   ;;  %s7107_s28 = smov %s5195_s29 }
 0x39a   : > { %s7108_s29 = smov %s5368_s24  ;;  %s7109_s30 = smov %s5203_s9 }
 0x39b   : > { %s7110_s9 = smov %s7112_s21  ;;  %25 = sbr.rel (!%p23_p9) target bundleno = 9 (0x9), region = 120 }
 0x3a2   :  { %3550 = vsyncpa [#allocation3], 1 }
 0x3a3   :  { %3552 = vsyncpa [#allocation3 + $0x1], 1 }
 0x3a4   :  { %3553 = vsyncpa [#allocation6], 1 }
 0x3a5   :  { %3554 = vsyncpa [#allocation4], 1 }
 0x3a6   :  { %3556 = vsyncpa [#allocation4 + $0x1], 1 }

</bundles_post_ra>
